<compile_context>
chip_gen: v7x
topology: tpu7x:2x2x1
jax: 0.10.0
libtpu: 0.0.40
codegen_flags: <defaults>
</compile_context>

<pallas_src>
import functools

import jax
import jax.numpy as jnp
from jax.experimental import pallas as pl
from jax.experimental.pallas import tpu as pltpu


def _rwkv5_chunk_kernel(x_ref, mix_ref, w_rkvg_ref, w_o_ref, dec_ref, rows_ref,
                        hdec_ref, lnp_ref, out_ref,
                        prevx_ref, state_ref, slab_ref,
                        *, head_size_divisor, eps):
    L, C = x_ref.shape
    _, H, N, _ = hdec_ref.shape
    f32 = jnp.float32
    bf16 = jnp.bfloat16

    ci = pl.program_id(1)                      # chunk index within the sequence

    @pl.when(ci == 0)
    def _init():
        prevx_ref[...] = jnp.zeros((1, C), f32)
        state_ref[...] = jnp.zeros((H, N, N), f32)

    x = x_ref[...]                             # (L, C) f32

    # time_shift == ZeroPad2d((0,0,1,-1)): xx[t] = x[t-1], carried across chunks.
    # XLU roll + row-0 select (no sublane-misaligned concat copy).
    row0 = jax.lax.broadcasted_iota(jnp.int32, (L, C), 0) == 0
    xx = jnp.where(row0, prevx_ref[...], pltpu.roll(x, shift=1, axis=0))
    prevx_ref[...] = x[L - 1:L, :]

    # Token mixing: xk = x*m + xx*(1-m) == xx + (x - xx)*m
    mix = mix_ref[...]                         # (4, C): [r, k, v, g]
    d = x - xx
    xr = xx + d * mix[0:1, :]
    xk = xx + d * mix[1:2, :]
    xv = xx + d * mix[2:3, :]
    xg = xx + d * mix[3:4, :]

    # Projections on the MXU (bf16 operands, f32 accumulation).
    r = jnp.dot(xr.astype(bf16), w_rkvg_ref[0], preferred_element_type=f32)
    k = jnp.dot(xk.astype(bf16), w_rkvg_ref[1], preferred_element_type=f32)
    v = jnp.dot(xv.astype(bf16), w_rkvg_ref[2], preferred_element_type=f32)
    g_lin = jnp.dot(xg.astype(bf16), w_rkvg_ref[3], preferred_element_type=f32)
    g = g_lin * jax.nn.sigmoid(g_lin)          # SiLU

    # Full-width (lane-dense) decay / bonus application, hoisted out of the head loop.
    dqc = dec_ref[0]                           # (L, A): w^(l - c0)
    dkc = dec_ref[1]                           # (L, A): w^(c0 - l - 1)
    u_row = rows_ref[0:1, :]                   # (1, A): time_faaaa
    wLc0_row = rows_ref[1:2, :]                # (1, A): w^(L - c0)

    rq = (r * dqc).astype(bf16)                # query side for inter + intra chunk
    kc_f = k * dkc
    ke = (kc_f * wLc0_row).astype(bf16)        # == k * w^(L-1-l), state update key
    kc = kc_f.astype(bf16)
    vb = v.astype(bf16)
    rku = r * u_row * k                        # (L, A) f32: bonus diagonal term

    li = jax.lax.broadcasted_iota(jnp.int32, (L, L), 0)
    si = jax.lax.broadcasted_iota(jnp.int32, (L, L), 1)
    strict_lower = li > si
    on_diag = li == si

    ln = lnp_ref[...]                          # (2, H, N)
    gamma = ln[0]
    beta = ln[1]
    inv_div = f32(1.0 / head_size_divisor)

    # Per-head WKV core + GroupNorm; each head writes its slice of the (L, A) slab.
    for h in range(H):
        sl = slice(h * N, (h + 1) * N)
        s0 = state_ref[h]                      # (N, N)  [key i, value j]
        wc0_h = hdec_ref[0, h]                 # (N, 1): w^c0
        wL_h = hdec_ref[1, h]                  # (N, 1): w^L

        rq_h = rq[:, sl]                       # (L, N)
        kc_h = kc[:, sl]
        ke_h = ke[:, sl]
        v_h = vb[:, sl]

        # Inter-chunk contribution: (r * w^(l-c0)) @ (w^c0 * S)
        y = jnp.dot(rq_h, (s0 * wc0_h).astype(bf16), preferred_element_type=f32)

        # Intra-chunk scores A[l,s] = sum_i r_l[i] k_s[i] w[i]^(l-s-1), s < l,
        # with the u-bonus folded onto the diagonal so it rides the a @ v matmul.
        a = jax.lax.dot_general(rq_h, kc_h, (((1,), (1,)), ((), ())),
                                preferred_element_type=f32)            # (L, L)
        diag = jnp.sum(rku[:, sl], axis=-1, keepdims=True)             # (L, 1)
        a = jnp.where(strict_lower, a, jnp.where(on_diag, diag, 0.0))
        y = y + jnp.dot(a.astype(bf16), v_h, preferred_element_type=f32)

        # State carry: S' = w^L * S + sum_s w^(L-1-s) k_s v_s^T
        state_ref[h] = wL_h * s0 + jax.lax.dot_general(
            ke_h, v_h, (((0,), (0,)), ((), ())), preferred_element_type=f32)

        # GroupNorm (per token, per head) on y / head_size_divisor.
        yd = y * inv_div
        mean = jnp.mean(yd, axis=-1, keepdims=True)
        var = jnp.mean(jnp.square(yd - mean), axis=-1, keepdims=True)
        nrm = (yd - mean) * jax.lax.rsqrt(var + eps)
        slab_ref[:, sl] = nrm * gamma[h:h + 1, :] + beta[h:h + 1, :]

    xo = (slab_ref[...] * g).astype(bf16)
    out_ref[...] = jnp.dot(xo, w_o_ref[...], preferred_element_type=f32)


def _pick_chunk(T):
    # L=128 is the vreg-pressure-safe default (matches the v5e 128x128 MXU); on
    # v6e/v7x L=256 can be passed explicitly after checking spill/ld-st pressure.
    for cand in (128, 64, 32, 16, 8):
        if T >= cand and T % cand == 0:
            return cand
    return T


def _vmem_limit_bytes():
    """Generation-aware VMEM budget: ~100 MiB on 128 MiB chips, ~56 MiB on v7x."""
    cap = 128 * 1024 * 1024
    try:
        info = pltpu.get_tpu_info()
        cap_attr = getattr(info, "vmem_capacity_bytes", None)
        if cap_attr:
            cap = int(cap_attr)
    except Exception:
        pass
    return int(max(32 * 1024 * 1024,
                   min(cap - 8 * 1024 * 1024, 100 * 1024 * 1024)))


def rwkv5_timemix_forward(x, params, head_size_divisor=8.0, eps=1e-5, chunk=None):
    B, T, C = x.shape
    H, N = params["time_decay"].shape
    A = H * N

    L = _pick_chunk(T) if chunk is None else chunk
    assert T % L == 0, "chunk must divide T"
    NC = T // L
    c0 = L // 2                                 # center exponents for f32 range

    x = x.astype(jnp.float32)

    # Fused mixing coefficients and weights ([r, k, v, g] order).
    mix = jnp.concatenate([params["time_mix_r"], params["time_mix_k"],
                           params["time_mix_v"], params["time_mix_g"]],
                          axis=0).astype(jnp.float32)                       # (4, C)
    w_rkvg = jnp.stack([params["w_r"], params["w_k"],
                        params["w_v"], params["w_g"]],
                       axis=0).astype(jnp.bfloat16)                         # (4, C, A)
    w_o = params["w_o"].astype(jnp.bfloat16)                                # (A, C)

    # Host-precomputed decay tables, lane-dense (columns ordered head-major = h*N+n).
    log_w = -jnp.exp(params["time_decay"].astype(jnp.float32))              # (H, N)
    log_w_row = log_w.reshape(1, A)                                         # (1, A)
    steps = jnp.arange(L, dtype=jnp.float32)[:, None]                       # (L, 1)
    dqc = jnp.exp(log_w_row * (steps - c0))                                 # w^(l-c0)
    dkc = jnp.exp(log_w_row * (c0 - steps - 1.0))                           # w^(c0-l-1)
    dec = jnp.stack([dqc, dkc], axis=0)                                     # (2, L, A)

    u_row = params["time_faaaa"].astype(jnp.float32).reshape(1, A)          # (1, A)
    wLc0_row = jnp.exp(log_w_row * float(L - c0))                           # (1, A)
    rows = jnp.concatenate([u_row, wLc0_row], axis=0)                       # (2, A)

    hdec = jnp.stack([jnp.exp(log_w * float(c0)),                           # w^c0
                      jnp.exp(log_w * float(L))], axis=0)[..., None]        # (2, H, N, 1)
    lnp = jnp.stack([params["ln_w"], params["ln_b"]], axis=0).astype(jnp.float32)

    kernel = functools.partial(_rwkv5_chunk_kernel,
                               head_size_divisor=float(head_size_divisor),
                               eps=float(eps))

    # Constants are whole-array VMEM refs: staged once, not double-buffered.
    def vmem_full():
        return pl.BlockSpec(memory_space=pltpu.MemorySpace.VMEM)

    in_specs = [
        pl.BlockSpec((None, L, C), lambda b, c: (b, c, 0)),   # x: one chunk per step
        vmem_full(),                                          # time-mix coeffs
        vmem_full(),                                          # W_r|W_k|W_v|W_g (bf16)
        vmem_full(),                                          # W_out (bf16)
        vmem_full(),                                          # decay tables (2, L, A)
        vmem_full(),                                          # [u, w^(L-c0)] rows
        vmem_full(),                                          # [w^c0, w^L] per head
        vmem_full(),                                          # GroupNorm gamma/beta
    ]
    out_specs = pl.BlockSpec((None, L, C), lambda b, c: (b, c, 0))

    return pl.pallas_call(
        kernel,
        out_shape=jax.ShapeDtypeStruct((B, T, C), jnp.float32),
        grid_spec=pltpu.PrefetchScalarGridSpec(
            num_scalar_prefetch=0,
            grid=(B, NC),
            in_specs=in_specs,
            out_specs=out_specs,
            scratch_shapes=[
                pltpu.VMEM((1, C), jnp.float32),      # last token of previous chunk
                pltpu.VMEM((H, N, N), jnp.float32),   # carried WKV state
                pltpu.VMEM((L, A), jnp.float32),      # per-head normed output slab
            ],
        ),
        compiler_params=pltpu.CompilerParams(
            dimension_semantics=("parallel", "arbitrary"),
            vmem_limit_bytes=_vmem_limit_bytes(),
        ),
    )(x, mix, w_rkvg, w_o, dec, rows, hdec, lnp)


def make_params(key, n_embd, dim_att, head_size, n_layer, layer_id):
    """Deterministic parameter init matching RWKV_TimeMix_RWKV5.__init__ shapes."""
    H = dim_att // head_size
    N = head_size
    ratio_0_to_1 = layer_id / (n_layer - 1)
    ratio_1_to_almost0 = 1.0 - layer_id / n_layer

    ddd = jnp.arange(n_embd, dtype=jnp.float32) / n_embd
    time_mix_k = jnp.power(ddd, ratio_1_to_almost0).reshape(1, n_embd)
    time_mix_v = (jnp.power(ddd, ratio_1_to_almost0) + 0.3 * ratio_0_to_1).reshape(1, n_embd)
    time_mix_r = jnp.power(ddd, 0.5 * ratio_1_to_almost0).reshape(1, n_embd)
    time_mix_g = jnp.power(ddd, 0.5 * ratio_1_to_almost0).reshape(1, n_embd)

    n = jnp.arange(dim_att, dtype=jnp.float32)
    decay_speed = -6.0 + 5.0 * (n / (dim_att - 1)) ** (0.7 + 1.3 * ratio_0_to_1)
    time_decay = decay_speed.reshape(H, N)
    zigzag = (((jnp.arange(dim_att) + 1) % 3).astype(jnp.float32) - 1.0) * 0.1
    time_faaaa = (ratio_0_to_1 * (1.0 - n / (dim_att - 1)) + zigzag).reshape(H, N)

    keys = jax.random.split(key, 5)
    s_in = 1.0 / (n_embd ** 0.5)
    s_att = 1.0 / (dim_att ** 0.5)
    w_r = jax.random.normal(keys[0], (n_embd, dim_att), jnp.float32) * s_in
    w_k = jax.random.normal(keys[1], (n_embd, dim_att), jnp.float32) * s_in
    w_v = jax.random.normal(keys[2], (n_embd, dim_att), jnp.float32) * s_in
    w_g = jax.random.normal(keys[3], (n_embd, dim_att), jnp.float32) * s_in
    w_o = jax.random.normal(keys[4], (dim_att, n_embd), jnp.float32) * s_att

    ln_w = jnp.ones((H, N), jnp.float32)   # GroupNorm default affine init
    ln_b = jnp.zeros((H, N), jnp.float32)

    return dict(time_mix_k=time_mix_k, time_mix_v=time_mix_v,
                time_mix_r=time_mix_r, time_mix_g=time_mix_g,
                w_r=w_r, w_k=w_k, w_v=w_v, w_g=w_g, w_o=w_o,
                time_decay=time_decay, time_faaaa=time_faaaa,
                ln_w=ln_w, ln_b=ln_b)


def rwkv5_timemix_reference(x, params, head_size_divisor=8.0, eps=1e-5):
    """Pure-JAX reference of the PyTorch forward (sequential recurrence, f32)."""
    B, T, C = x.shape
    H, N = params["time_decay"].shape
    A = H * N
    hp = jax.lax.Precision.HIGHEST

    xx = jnp.pad(x, ((0, 0), (1, 0), (0, 0)))[:, :T, :]
    mk = params["time_mix_k"].reshape(1, 1, C)
    mv = params["time_mix_v"].reshape(1, 1, C)
    mr = params["time_mix_r"].reshape(1, 1, C)
    mg = params["time_mix_g"].reshape(1, 1, C)
    xk = x * mk + xx * (1 - mk)
    xv = x * mv + xx * (1 - mv)
    xr = x * mr + xx * (1 - mr)
    xg = x * mg + xx * (1 - mg)

    proj = lambda a, w: jnp.einsum('btc,cd->btd', a, w, precision=hp)
    r = proj(xr, params["w_r"]).reshape(B, T, H, N)
    k = proj(xk, params["w_k"]).reshape(B, T, H, N)
    v = proj(xv, params["w_v"]).reshape(B, T, H, N)
    g = jax.nn.silu(proj(xg, params["w_g"]))

    w = jnp.exp(-jnp.exp(params["time_decay"]))
    u = params["time_faaaa"]
    state = jnp.zeros((B, H, N, N), jnp.float32)
    ys = []
    for t in range(T):
        rt, kt, vt = r[:, t], k[:, t], v[:, t]               # (B, H, N)
        kv = kt[:, :, :, None] * vt[:, :, None, :]           # (B, H, N, N)
        yt = jnp.sum(rt[:, :, :, None] * (u[None, :, :, None] * kv + state), axis=2)
        ys.append(yt)
        state = state * w[None, :, :, None] + kv
    y = jnp.stack(ys, axis=1)                                # (B, T, H, N)

    yd = y / head_size_divisor
    mean = yd.mean(-1, keepdims=True)
    var = ((yd - mean) ** 2).mean(-1, keepdims=True)
    normed = (yd - mean) / jnp.sqrt(var + eps)
    normed = normed * params["ln_w"][None, None] + params["ln_b"][None, None]
    xo = normed.reshape(B, T, A) * g
    return jnp.einsum('bta,ac->btc', xo, params["w_o"], precision=hp)


if __name__ == "__main__":
    # Small config consistent with the module: HEAD_SIZE=8, dim_att=n_embd=32.
    B, T = 2, 8
    n_embd = 32
    dim_att = 32
    head_size = 8
    n_layer = 4
    layer_id = 1
    head_size_divisor = 8.0

    key = jax.random.PRNGKey(0)
    kx, kp = jax.random.split(key)
    params = make_params(kp, n_embd, dim_att, head_size, n_layer, layer_id)
    x = jax.random.normal(kx, (B, T, n_embd), jnp.float32)

    out = rwkv5_timemix_forward(x, params, head_size_divisor=head_size_divisor)
    out = jax.block_until_ready(out)

    # Reference with the kernel's (deliberate) bf16 weight storage applied, so the
    # check isolates kernel math from the quantization policy; relative bound.
    params_q = dict(params)
    for kname in ("w_r", "w_k", "w_v", "w_g", "w_o"):
        params_q[kname] = params[kname].astype(jnp.bfloat16).astype(jnp.float32)
    ref = rwkv5_timemix_reference(x, params_q, head_size_divisor=head_size_divisor)

    scale = jnp.maximum(jnp.max(jnp.abs(ref)), 1e-3)
    rel_err = float(jnp.max(jnp.abs(out - ref)) / scale)
    if not (rel_err < 4e-2):
        raise AssertionError(f"Pallas kernel mismatch vs reference: rel err = {rel_err}")

    print("KERNEL_OK")
</pallas_src>

<mosaic_0001>
module attributes {stable_mosaic.version = 11 : i64} {
  func.func @_rwkv5_chunk_kernel(%arg0: i32, %arg1: i32, %arg2: memref<1x8x32xf32, #tpu.memory_space<vmem>>, %arg3: memref<4x32xf32, #tpu.memory_space<vmem>>, %arg4: memref<4x32x32xbf16, #tpu.memory_space<vmem>>, %arg5: memref<32x32xbf16, #tpu.memory_space<vmem>>, %arg6: memref<2x8x32xf32, #tpu.memory_space<vmem>>, %arg7: memref<2x32xf32, #tpu.memory_space<vmem>>, %arg8: memref<2x4x8x1xf32, #tpu.memory_space<vmem>>, %arg9: memref<2x4x8xf32, #tpu.memory_space<vmem>>, %arg10: memref<1x8x32xf32, #tpu.memory_space<vmem>>, %arg11: memref<1x32xf32, #tpu.memory_space<vmem>>, %arg12: memref<4x8x8xf32, #tpu.memory_space<vmem>>, %arg13: memref<8x32xf32, #tpu.memory_space<vmem>>) attributes {dimension_semantics = [#tpu.dimension_semantics<parallel>, #tpu.dimension_semantics<arbitrary>], iteration_bounds = array<i64: 2, 1>, scalar_prefetch = 0 : i64, scratch_operands = 3 : i64, tpu.core_type = #tpu.core_type<tc>, window_params = [{transform_indices = @transform_0, window_bounds = array<i64: 1, 8, 32>}, {pipeline_mode = #tpu.pipeline_mode<synchronous>, transform_indices = @transform_1, window_bounds = array<i64: 4, 32>}, {pipeline_mode = #tpu.pipeline_mode<synchronous>, transform_indices = @transform_2, window_bounds = array<i64: 4, 32, 32>}, {pipeline_mode = #tpu.pipeline_mode<synchronous>, transform_indices = @transform_3, window_bounds = array<i64: 32, 32>}, {pipeline_mode = #tpu.pipeline_mode<synchronous>, transform_indices = @transform_4, window_bounds = array<i64: 2, 8, 32>}, {pipeline_mode = #tpu.pipeline_mode<synchronous>, transform_indices = @transform_5, window_bounds = array<i64: 2, 32>}, {pipeline_mode = #tpu.pipeline_mode<synchronous>, transform_indices = @transform_6, window_bounds = array<i64: 2, 4, 8, 1>}, {pipeline_mode = #tpu.pipeline_mode<synchronous>, transform_indices = @transform_7, window_bounds = array<i64: 2, 4, 8>}, {transform_indices = @transform_8, window_bounds = array<i64: 1, 8, 32>}]} {
    %c0_i32 = arith.constant 0 : i32
    %0 = arith.cmpi eq, %arg1, %c0_i32 : i32
    %1 = arith.extui %0 : i1 to i32
    %c0_i32_0 = arith.constant 0 : i32
    %2 = arith.cmpi ne, %1, %c0_i32_0 : i32
    scf.if %2 {
      %cst_153 = arith.constant 0.000000e+00 : f32
      %329 = vector.broadcast %cst_153 : f32 to vector<1x32xf32>
      %c0_154 = arith.constant 0 : index
      %c0_155 = arith.constant 0 : index
      %330 = vector.load %arg11[%c0_154, %c0_155] : memref<1x32xf32, #tpu.memory_space<vmem>>, vector<1x32xf32>
      tpu.vector_store %arg11[%c0_154, %c0_155], %329 {strides = array<i32>} : memref<1x32xf32, #tpu.memory_space<vmem>>, vector<1x32xf32>,
      %cst_156 = arith.constant 0.000000e+00 : f32
      %331 = vector.broadcast %cst_156 : f32 to vector<4x8x8xf32>
      %c0_157 = arith.constant 0 : index
      %c0_158 = arith.constant 0 : index
      %c0_159 = arith.constant 0 : index
      %332 = vector.load %arg12[%c0_157, %c0_158, %c0_159] : memref<4x8x8xf32, #tpu.memory_space<vmem>>, vector<4x8x8xf32>
      tpu.vector_store %arg12[%c0_157, %c0_158, %c0_159], %331 {strides = array<i32>} : memref<4x8x8xf32, #tpu.memory_space<vmem>>, vector<4x8x8xf32>,
    } else {
    }
    %c0 = arith.constant 0 : index
    %c0_1 = arith.constant 0 : index
    %c0_2 = arith.constant 0 : index
    %3 = vector.load %arg2[%c0, %c0_1, %c0_2] : memref<1x8x32xf32, #tpu.memory_space<vmem>>, vector<1x8x32xf32>
    %4 = vector.shape_cast %3 : vector<1x8x32xf32> to vector<8x32xf32>
    %5 = tpu.iota {dimensions = array<i32: 0>} : vector<8x32xi32>
    %c0_i32_3 = arith.constant 0 : i32
    %6 = vector.broadcast %c0_i32_3 : i32 to vector<8x32xi32>
    %7 = arith.cmpi eq, %5, %6 : vector<8x32xi32>
    %c0_4 = arith.constant 0 : index
    %c0_5 = arith.constant 0 : index
    %8 = vector.load %arg11[%c0_4, %c0_5] : memref<1x32xf32, #tpu.memory_space<vmem>>, vector<1x32xf32>
    %c1_i32 = arith.constant 1 : i32
    %9 = tpu.dynamic_rotate %4 by %c1_i32 dim 0 : vector<8x32xf32>, i32 -> vector<8x32xf32>
    %10 = vector.shape_cast %8 : vector<1x32xf32> to vector<1x32xf32>
    %11 = vector.broadcast %10 : vector<1x32xf32> to vector<8x32xf32>
    %12 = arith.select %7, %11, %9 : vector<8x32xi1>, vector<8x32xf32>
    %13 = vector.extract_strided_slice %4 {offsets = [7, 0], sizes = [1, 32], strides = [1, 1]} : vector<8x32xf32> to vector<1x32xf32>
    %c0_6 = arith.constant 0 : index
    %c0_7 = arith.constant 0 : index
    %14 = vector.load %arg11[%c0_6, %c0_7] : memref<1x32xf32, #tpu.memory_space<vmem>>, vector<1x32xf32>
    tpu.vector_store %arg11[%c0_6, %c0_7], %13 {strides = array<i32>} : memref<1x32xf32, #tpu.memory_space<vmem>>, vector<1x32xf32>,
    %c0_8 = arith.constant 0 : index
    %c0_9 = arith.constant 0 : index
    %15 = vector.load %arg3[%c0_8, %c0_9] : memref<4x32xf32, #tpu.memory_space<vmem>>, vector<4x32xf32>
    %16 = arith.subf %4, %12 : vector<8x32xf32>
    %17 = vector.extract_strided_slice %15 {offsets = [0, 0], sizes = [1, 32], strides = [1, 1]} : vector<4x32xf32> to vector<1x32xf32>
    %18 = vector.broadcast %17 : vector<1x32xf32> to vector<8x32xf32>
    %19 = arith.mulf %16, %18 : vector<8x32xf32>
    %20 = arith.addf %12, %19 : vector<8x32xf32>
    %21 = vector.extract_strided_slice %15 {offsets = [1, 0], sizes = [1, 32], strides = [1, 1]} : vector<4x32xf32> to vector<1x32xf32>
    %22 = vector.broadcast %21 : vector<1x32xf32> to vector<8x32xf32>
    %23 = arith.mulf %16, %22 : vector<8x32xf32>
    %24 = arith.addf %12, %23 : vector<8x32xf32>
    %25 = vector.extract_strided_slice %15 {offsets = [2, 0], sizes = [1, 32], strides = [1, 1]} : vector<4x32xf32> to vector<1x32xf32>
    %26 = vector.broadcast %25 : vector<1x32xf32> to vector<8x32xf32>
    %27 = arith.mulf %16, %26 : vector<8x32xf32>
    %28 = arith.addf %12, %27 : vector<8x32xf32>
    %29 = vector.extract_strided_slice %15 {offsets = [3, 0], sizes = [1, 32], strides = [1, 1]} : vector<4x32xf32> to vector<1x32xf32>
    %30 = vector.broadcast %29 : vector<1x32xf32> to vector<8x32xf32>
    %31 = arith.mulf %16, %30 : vector<8x32xf32>
    %32 = arith.addf %12, %31 : vector<8x32xf32>
    %33 = arith.truncf %20 : vector<8x32xf32> to vector<8x32xbf16>
    %c0_10 = arith.constant 0 : index
    %c0_11 = arith.constant 0 : index
    %c0_12 = arith.constant 0 : index
    %34 = vector.load %arg4[%c0_10, %c0_11, %c0_12] : memref<4x32x32xbf16, #tpu.memory_space<vmem>>, vector<1x32x32xbf16>
    %35 = vector.shape_cast %34 : vector<1x32x32xbf16> to vector<32x32xbf16>
    %cst = arith.constant dense<0.000000e+00> : vector<8x32xf32>
    %36 = tpu.matmul %33, %35, %cst {dimension_numbers = #tpu.dot_dimension_numbers<[1], [0], [0], [1], [0, 0, 1, 1], [], []>} : vector<8x32xbf16>, vector<32x32xbf16>, vector<8x32xf32> -> vector<8x32xf32>
    %37 = arith.truncf %24 : vector<8x32xf32> to vector<8x32xbf16>
    %c1 = arith.constant 1 : index
    %c0_13 = arith.constant 0 : index
    %c0_14 = arith.constant 0 : index
    %38 = vector.load %arg4[%c1, %c0_13, %c0_14] : memref<4x32x32xbf16, #tpu.memory_space<vmem>>, vector<1x32x32xbf16>
    %39 = vector.shape_cast %38 : vector<1x32x32xbf16> to vector<32x32xbf16>
    %cst_15 = arith.constant dense<0.000000e+00> : vector<8x32xf32>
    %40 = tpu.matmul %37, %39, %cst_15 {dimension_numbers = #tpu.dot_dimension_numbers<[1], [0], [0], [1], [0, 0, 1, 1], [], []>} : vector<8x32xbf16>, vector<32x32xbf16>, vector<8x32xf32> -> vector<8x32xf32>
    %41 = arith.truncf %28 : vector<8x32xf32> to vector<8x32xbf16>
    %c2 = arith.constant 2 : index
    %c0_16 = arith.constant 0 : index
    %c0_17 = arith.constant 0 : index
    %42 = vector.load %arg4[%c2, %c0_16, %c0_17] : memref<4x32x32xbf16, #tpu.memory_space<vmem>>, vector<1x32x32xbf16>
    %43 = vector.shape_cast %42 : vector<1x32x32xbf16> to vector<32x32xbf16>
    %cst_18 = arith.constant dense<0.000000e+00> : vector<8x32xf32>
    %44 = tpu.matmul %41, %43, %cst_18 {dimension_numbers = #tpu.dot_dimension_numbers<[1], [0], [0], [1], [0, 0, 1, 1], [], []>} : vector<8x32xbf16>, vector<32x32xbf16>, vector<8x32xf32> -> vector<8x32xf32>
    %45 = arith.truncf %32 : vector<8x32xf32> to vector<8x32xbf16>
    %c3 = arith.constant 3 : index
    %c0_19 = arith.constant 0 : index
    %c0_20 = arith.constant 0 : index
    %46 = vector.load %arg4[%c3, %c0_19, %c0_20] : memref<4x32x32xbf16, #tpu.memory_space<vmem>>, vector<1x32x32xbf16>
    %47 = vector.shape_cast %46 : vector<1x32x32xbf16> to vector<32x32xbf16>
    %cst_21 = arith.constant dense<0.000000e+00> : vector<8x32xf32>
    %48 = tpu.matmul %45, %47, %cst_21 {dimension_numbers = #tpu.dot_dimension_numbers<[1], [0], [0], [1], [0, 0, 1, 1], [], []>} : vector<8x32xbf16>, vector<32x32xbf16>, vector<8x32xf32> -> vector<8x32xf32>
    %49 = arith.negf %48 : vector<8x32xf32>
    %50 = math.exp %49 : vector<8x32xf32>
    %cst_22 = arith.constant 1.000000e+00 : f32
    %51 = vector.broadcast %cst_22 : f32 to vector<8x32xf32>
    %52 = arith.addf %51, %50 : vector<8x32xf32>
    %53 = arith.divf %51, %52 : vector<8x32xf32>
    %54 = arith.mulf %48, %53 : vector<8x32xf32>
    %c0_23 = arith.constant 0 : index
    %c0_24 = arith.constant 0 : index
    %c0_25 = arith.constant 0 : index
    %55 = vector.load %arg6[%c0_23, %c0_24, %c0_25] : memref<2x8x32xf32, #tpu.memory_space<vmem>>, vector<1x8x32xf32>
    %56 = vector.shape_cast %55 : vector<1x8x32xf32> to vector<8x32xf32>
    %c1_26 = arith.constant 1 : index
    %c0_27 = arith.constant 0 : index
    %c0_28 = arith.constant 0 : index
    %57 = vector.load %arg6[%c1_26, %c0_27, %c0_28] : memref<2x8x32xf32, #tpu.memory_space<vmem>>, vector<1x8x32xf32>
    %58 = vector.shape_cast %57 : vector<1x8x32xf32> to vector<8x32xf32>
    %c0_29 = arith.constant 0 : index
    %c0_30 = arith.constant 0 : index
    %59 = vector.load %arg7[%c0_29, %c0_30] : memref<2x32xf32, #tpu.memory_space<vmem>>, vector<1x32xf32>
    %c1_31 = arith.constant 1 : index
    %c0_32 = arith.constant 0 : index
    %60 = vector.load %arg7[%c1_31, %c0_32] : memref<2x32xf32, #tpu.memory_space<vmem>>, vector<1x32xf32>
    %61 = arith.mulf %36, %56 : vector<8x32xf32>
    %62 = arith.truncf %61 : vector<8x32xf32> to vector<8x32xbf16>
    %63 = arith.mulf %40, %58 : vector<8x32xf32>
    %64 = vector.broadcast %60 : vector<1x32xf32> to vector<8x32xf32>
    %65 = arith.mulf %63, %64 : vector<8x32xf32>
    %66 = arith.truncf %65 : vector<8x32xf32> to vector<8x32xbf16>
    %67 = arith.truncf %63 : vector<8x32xf32> to vector<8x32xbf16>
    %68 = arith.truncf %44 : vector<8x32xf32> to vector<8x32xbf16>
    %69 = vector.broadcast %59 : vector<1x32xf32> to vector<8x32xf32>
    %70 = arith.mulf %36, %69 : vector<8x32xf32>
    %71 = arith.mulf %70, %40 : vector<8x32xf32>
    %72 = tpu.iota {dimensions = array<i32: 0>} : vector<8x8xi32>
    %73 = tpu.iota {dimensions = array<i32: 1>} : vector<8x8xi32>
    %74 = arith.cmpi sgt, %72, %73 : vector<8x8xi32>
    %75 = arith.cmpi eq, %72, %73 : vector<8x8xi32>
    %c0_33 = arith.constant 0 : index
    %c0_34 = arith.constant 0 : index
    %c0_35 = arith.constant 0 : index
    %76 = vector.load %arg9[%c0_33, %c0_34, %c0_35] : memref<2x4x8xf32, #tpu.memory_space<vmem>>, vector<2x4x8xf32>
    %77 = vector.extract_strided_slice %76 {offsets = [0, 0, 0], sizes = [1, 4, 8], strides = [1, 1, 1]} : vector<2x4x8xf32> to vector<1x4x8xf32>
    %78 = vector.shape_cast %77 : vector<1x4x8xf32> to vector<4x8xf32>
    %79 = vector.extract_strided_slice %76 {offsets = [1, 0, 0], sizes = [1, 4, 8], strides = [1, 1, 1]} : vector<2x4x8xf32> to vector<1x4x8xf32>
    %80 = vector.shape_cast %79 : vector<1x4x8xf32> to vector<4x8xf32>
    %c0_36 = arith.constant 0 : index
    %c0_37 = arith.constant 0 : index
    %c0_38 = arith.constant 0 : index
    %81 = vector.load %arg12[%c0_36, %c0_37, %c0_38] : memref<4x8x8xf32, #tpu.memory_space<vmem>>, vector<1x8x8xf32>
    %82 = vector.shape_cast %81 : vector<1x8x8xf32> to vector<8x8xf32>
    %c0_39 = arith.constant 0 : index
    %c0_40 = arith.constant 0 : index
    %c0_41 = arith.constant 0 : index
    %c0_42 = arith.constant 0 : index
    %83 = vector.load %arg8[%c0_39, %c0_40, %c0_41, %c0_42] : memref<2x4x8x1xf32, #tpu.memory_space<vmem>>, vector<1x1x8x1xf32>
    %84 = vector.shape_cast %83 : vector<1x1x8x1xf32> to vector<8x1xf32>
    %c1_43 = arith.constant 1 : index
    %c0_44 = arith.constant 0 : index
    %c0_45 = arith.constant 0 : index
    %c0_46 = arith.constant 0 : index
    %85 = vector.load %arg8[%c1_43, %c0_44, %c0_45, %c0_46] : memref<2x4x8x1xf32, #tpu.memory_space<vmem>>, vector<1x1x8x1xf32>
    %86 = vector.shape_cast %85 : vector<1x1x8x1xf32> to vector<8x1xf32>
    %87 = vector.extract_strided_slice %62 {offsets = [0, 0], sizes = [8, 8], strides = [1, 1]} : vector<8x32xbf16> to vector<8x8xbf16>
    %88 = vector.extract_strided_slice %67 {offsets = [0, 0], sizes = [8, 8], strides = [1, 1]} : vector<8x32xbf16> to vector<8x8xbf16>
    %89 = vector.extract_strided_slice %66 {offsets = [0, 0], sizes = [8, 8], strides = [1, 1]} : vector<8x32xbf16> to vector<8x8xbf16>
    %90 = vector.extract_strided_slice %68 {offsets = [0, 0], sizes = [8, 8], strides = [1, 1]} : vector<8x32xbf16> to vector<8x8xbf16>
    %91 = vector.broadcast %84 : vector<8x1xf32> to vector<8x8xf32>
    %92 = arith.mulf %82, %91 : vector<8x8xf32>
    %93 = arith.truncf %92 : vector<8x8xf32> to vector<8x8xbf16>
    %cst_47 = arith.constant dense<0.000000e+00> : vector<8x8xf32>
    %94 = tpu.matmul %87, %93, %cst_47 {dimension_numbers = #tpu.dot_dimension_numbers<[1], [0], [0], [1], [0, 0, 1, 1], [], []>} : vector<8x8xbf16>, vector<8x8xbf16>, vector<8x8xf32> -> vector<8x8xf32>
    %cst_48 = arith.constant dense<0.000000e+00> : vector<8x8xf32>
    %95 = tpu.matmul %87, %88, %cst_48 {dimension_numbers = #tpu.dot_dimension_numbers<[1], [1], [0], [0], [0, 0, 1, 0], [], []>} : vector<8x8xbf16>, vector<8x8xbf16>, vector<8x8xf32> -> vector<8x8xf32>
    %96 = vector.extract_strided_slice %71 {offsets = [0, 0], sizes = [8, 8], strides = [1, 1]} : vector<8x32xf32> to vector<8x8xf32>
    %cst_49 = arith.constant dense<0.000000e+00> : vector<8xf32>
    %97 = vector.multi_reduction <add>, %96, %cst_49 [1] : vector<8x8xf32> to vector<8xf32>
    %98 = vector.shape_cast %97 : vector<8xf32> to vector<8x1xf32>
    %cst_50 = arith.constant 0.000000e+00 : f32
    %99 = vector.shape_cast %98 : vector<8x1xf32> to vector<8x1xf32>
    %100 = vector.broadcast %99 : vector<8x1xf32> to vector<8x8xf32>
    %101 = vector.broadcast %cst_50 : f32 to vector<8x8xf32>
    %102 = arith.select %75, %100, %101 : vector<8x8xi1>, vector<8x8xf32>
    %103 = arith.select %74, %95, %102 : vector<8x8xi1>, vector<8x8xf32>
    %104 = arith.truncf %103 : vector<8x8xf32> to vector<8x8xbf16>
    %cst_51 = arith.constant dense<0.000000e+00> : vector<8x8xf32>
    %105 = tpu.matmul %104, %90, %cst_51 {dimension_numbers = #tpu.dot_dimension_numbers<[1], [0], [0], [1], [0, 0, 1, 1], [], []>} : vector<8x8xbf16>, vector<8x8xbf16>, vector<8x8xf32> -> vector<8x8xf32>
    %106 = arith.addf %94, %105 : vector<8x8xf32>
    %107 = vector.broadcast %86 : vector<8x1xf32> to vector<8x8xf32>
    %108 = arith.mulf %107, %82 : vector<8x8xf32>
    %cst_52 = arith.constant dense<0.000000e+00> : vector<8x8xf32>
    %109 = tpu.matmul %89, %90, %cst_52 {dimension_numbers = #tpu.dot_dimension_numbers<[0], [0], [1], [1], [0, 1, 1, 1], [], []>} : vector<8x8xbf16>, vector<8x8xbf16>, vector<8x8xf32> -> vector<8x8xf32>
    %110 = arith.addf %108, %109 : vector<8x8xf32>
    %c0_53 = arith.constant 0 : index
    %c0_54 = arith.constant 0 : index
    %c0_55 = arith.constant 0 : index
    %111 = vector.load %arg12[%c0_53, %c0_54, %c0_55] : memref<4x8x8xf32, #tpu.memory_space<vmem>>, vector<1x8x8xf32>
    %112 = vector.shape_cast %111 : vector<1x8x8xf32> to vector<8x8xf32>
    %113 = vector.shape_cast %110 : vector<8x8xf32> to vector<1x8x8xf32>
    tpu.vector_store %arg12[%c0_53, %c0_54, %c0_55], %113 {strides = array<i32>} : memref<4x8x8xf32, #tpu.memory_space<vmem>>, vector<1x8x8xf32>,
    %cst_56 = arith.constant 1.250000e-01 : f32
    %114 = vector.broadcast %cst_56 : f32 to vector<8x8xf32>
    %115 = arith.mulf %106, %114 : vector<8x8xf32>
    %cst_57 = arith.constant dense<0.000000e+00> : vector<8xf32>
    %116 = vector.multi_reduction <add>, %115, %cst_57 [1] : vector<8x8xf32> to vector<8xf32>
    %117 = vector.shape_cast %116 : vector<8xf32> to vector<8x1xf32>
    %cst_58 = arith.constant 8.000000e+00 : f32
    %118 = vector.broadcast %cst_58 : f32 to vector<8x1xf32>
    %119 = arith.divf %117, %118 : vector<8x1xf32>
    %120 = vector.broadcast %119 : vector<8x1xf32> to vector<8x8xf32>
    %121 = arith.subf %115, %120 : vector<8x8xf32>
    %122 = arith.mulf %121, %121 : vector<8x8xf32>
    %cst_59 = arith.constant dense<0.000000e+00> : vector<8xf32>
    %123 = vector.multi_reduction <add>, %122, %cst_59 [1] : vector<8x8xf32> to vector<8xf32>
    %124 = vector.shape_cast %123 : vector<8xf32> to vector<8x1xf32>
    %cst_60 = arith.constant 8.000000e+00 : f32
    %125 = vector.broadcast %cst_60 : f32 to vector<8x1xf32>
    %126 = arith.divf %124, %125 : vector<8x1xf32>
    %127 = vector.broadcast %119 : vector<8x1xf32> to vector<8x8xf32>
    %128 = arith.subf %115, %127 : vector<8x8xf32>
    %cst_61 = arith.constant 9.99999974E-6 : f32
    %129 = vector.broadcast %cst_61 : f32 to vector<8x1xf32>
    %130 = arith.addf %126, %129 : vector<8x1xf32>
    %131 = math.rsqrt %130 : vector<8x1xf32>
    %132 = vector.broadcast %131 : vector<8x1xf32> to vector<8x8xf32>
    %133 = arith.mulf %128, %132 : vector<8x8xf32>
    %134 = vector.extract_strided_slice %78 {offsets = [0, 0], sizes = [1, 8], strides = [1, 1]} : vector<4x8xf32> to vector<1x8xf32>
    %135 = vector.broadcast %134 : vector<1x8xf32> to vector<8x8xf32>
    %136 = arith.mulf %133, %135 : vector<8x8xf32>
    %137 = vector.extract_strided_slice %80 {offsets = [0, 0], sizes = [1, 8], strides = [1, 1]} : vector<4x8xf32> to vector<1x8xf32>
    %138 = vector.broadcast %137 : vector<1x8xf32> to vector<8x8xf32>
    %139 = arith.addf %136, %138 : vector<8x8xf32>
    %c0_62 = arith.constant 0 : index
    %c0_63 = arith.constant 0 : index
    %140 = vector.load %arg13[%c0_62, %c0_63] : memref<8x32xf32, #tpu.memory_space<vmem>>, vector<8x8xf32>
    tpu.vector_store %arg13[%c0_62, %c0_63], %139 {strides = array<i32>} : memref<8x32xf32, #tpu.memory_space<vmem>>, vector<8x8xf32>,
    %c1_64 = arith.constant 1 : index
    %c0_65 = arith.constant 0 : index
    %c0_66 = arith.constant 0 : index
    %141 = vector.load %arg12[%c1_64, %c0_65, %c0_66] : memref<4x8x8xf32, #tpu.memory_space<vmem>>, vector<1x8x8xf32>
    %142 = vector.shape_cast %141 : vector<1x8x8xf32> to vector<8x8xf32>
    %c0_67 = arith.constant 0 : index
    %c1_68 = arith.constant 1 : index
    %c0_69 = arith.constant 0 : index
    %c0_70 = arith.constant 0 : index
    %143 = vector.load %arg8[%c0_67, %c1_68, %c0_69, %c0_70] : memref<2x4x8x1xf32, #tpu.memory_space<vmem>>, vector<1x1x8x1xf32>
    %144 = vector.shape_cast %143 : vector<1x1x8x1xf32> to vector<8x1xf32>
    %c1_71 = arith.constant 1 : index
    %c1_72 = arith.constant 1 : index
    %c0_73 = arith.constant 0 : index
    %c0_74 = arith.constant 0 : index
    %145 = vector.load %arg8[%c1_71, %c1_72, %c0_73, %c0_74] : memref<2x4x8x1xf32, #tpu.memory_space<vmem>>, vector<1x1x8x1xf32>
    %146 = vector.shape_cast %145 : vector<1x1x8x1xf32> to vector<8x1xf32>
    %147 = vector.extract_strided_slice %62 {offsets = [0, 8], sizes = [8, 8], strides = [1, 1]} : vector<8x32xbf16> to vector<8x8xbf16>
    %148 = vector.extract_strided_slice %67 {offsets = [0, 8], sizes = [8, 8], strides = [1, 1]} : vector<8x32xbf16> to vector<8x8xbf16>
    %149 = vector.extract_strided_slice %66 {offsets = [0, 8], sizes = [8, 8], strides = [1, 1]} : vector<8x32xbf16> to vector<8x8xbf16>
    %150 = vector.extract_strided_slice %68 {offsets = [0, 8], sizes = [8, 8], strides = [1, 1]} : vector<8x32xbf16> to vector<8x8xbf16>
    %151 = vector.broadcast %144 : vector<8x1xf32> to vector<8x8xf32>
    %152 = arith.mulf %142, %151 : vector<8x8xf32>
    %153 = arith.truncf %152 : vector<8x8xf32> to vector<8x8xbf16>
    %cst_75 = arith.constant dense<0.000000e+00> : vector<8x8xf32>
    %154 = tpu.matmul %147, %153, %cst_75 {dimension_numbers = #tpu.dot_dimension_numbers<[1], [0], [0], [1], [0, 0, 1, 1], [], []>} : vector<8x8xbf16>, vector<8x8xbf16>, vector<8x8xf32> -> vector<8x8xf32>
    %cst_76 = arith.constant dense<0.000000e+00> : vector<8x8xf32>
    %155 = tpu.matmul %147, %148, %cst_76 {dimension_numbers = #tpu.dot_dimension_numbers<[1], [1], [0], [0], [0, 0, 1, 0], [], []>} : vector<8x8xbf16>, vector<8x8xbf16>, vector<8x8xf32> -> vector<8x8xf32>
    %156 = vector.extract_strided_slice %71 {offsets = [0, 8], sizes = [8, 8], strides = [1, 1]} : vector<8x32xf32> to vector<8x8xf32>
    %cst_77 = arith.constant dense<0.000000e+00> : vector<8xf32>
    %157 = vector.multi_reduction <add>, %156, %cst_77 [1] : vector<8x8xf32> to vector<8xf32>
    %158 = vector.shape_cast %157 : vector<8xf32> to vector<8x1xf32>
    %cst_78 = arith.constant 0.000000e+00 : f32
    %159 = vector.shape_cast %158 : vector<8x1xf32> to vector<8x1xf32>
    %160 = vector.broadcast %159 : vector<8x1xf32> to vector<8x8xf32>
    %161 = vector.broadcast %cst_78 : f32 to vector<8x8xf32>
    %162 = arith.select %75, %160, %161 : vector<8x8xi1>, vector<8x8xf32>
    %163 = arith.select %74, %155, %162 : vector<8x8xi1>, vector<8x8xf32>
    %164 = arith.truncf %163 : vector<8x8xf32> to vector<8x8xbf16>
    %cst_79 = arith.constant dense<0.000000e+00> : vector<8x8xf32>
    %165 = tpu.matmul %164, %150, %cst_79 {dimension_numbers = #tpu.dot_dimension_numbers<[1], [0], [0], [1], [0, 0, 1, 1], [], []>} : vector<8x8xbf16>, vector<8x8xbf16>, vector<8x8xf32> -> vector<8x8xf32>
    %166 = arith.addf %154, %165 : vector<8x8xf32>
    %167 = vector.broadcast %146 : vector<8x1xf32> to vector<8x8xf32>
    %168 = arith.mulf %167, %142 : vector<8x8xf32>
    %cst_80 = arith.constant dense<0.000000e+00> : vector<8x8xf32>
    %169 = tpu.matmul %149, %150, %cst_80 {dimension_numbers = #tpu.dot_dimension_numbers<[0], [0], [1], [1], [0, 1, 1, 1], [], []>} : vector<8x8xbf16>, vector<8x8xbf16>, vector<8x8xf32> -> vector<8x8xf32>
    %170 = arith.addf %168, %169 : vector<8x8xf32>
    %c1_81 = arith.constant 1 : index
    %c0_82 = arith.constant 0 : index
    %c0_83 = arith.constant 0 : index
    %171 = vector.load %arg12[%c1_81, %c0_82, %c0_83] : memref<4x8x8xf32, #tpu.memory_space<vmem>>, vector<1x8x8xf32>
    %172 = vector.shape_cast %171 : vector<1x8x8xf32> to vector<8x8xf32>
    %173 = vector.shape_cast %170 : vector<8x8xf32> to vector<1x8x8xf32>
    tpu.vector_store %arg12[%c1_81, %c0_82, %c0_83], %173 {strides = array<i32>} : memref<4x8x8xf32, #tpu.memory_space<vmem>>, vector<1x8x8xf32>,
    %cst_84 = arith.constant 1.250000e-01 : f32
    %174 = vector.broadcast %cst_84 : f32 to vector<8x8xf32>
    %175 = arith.mulf %166, %174 : vector<8x8xf32>
    %cst_85 = arith.constant dense<0.000000e+00> : vector<8xf32>
    %176 = vector.multi_reduction <add>, %175, %cst_85 [1] : vector<8x8xf32> to vector<8xf32>
    %177 = vector.shape_cast %176 : vector<8xf32> to vector<8x1xf32>
    %cst_86 = arith.constant 8.000000e+00 : f32
    %178 = vector.broadcast %cst_86 : f32 to vector<8x1xf32>
    %179 = arith.divf %177, %178 : vector<8x1xf32>
    %180 = vector.broadcast %179 : vector<8x1xf32> to vector<8x8xf32>
    %181 = arith.subf %175, %180 : vector<8x8xf32>
    %182 = arith.mulf %181, %181 : vector<8x8xf32>
    %cst_87 = arith.constant dense<0.000000e+00> : vector<8xf32>
    %183 = vector.multi_reduction <add>, %182, %cst_87 [1] : vector<8x8xf32> to vector<8xf32>
    %184 = vector.shape_cast %183 : vector<8xf32> to vector<8x1xf32>
    %cst_88 = arith.constant 8.000000e+00 : f32
    %185 = vector.broadcast %cst_88 : f32 to vector<8x1xf32>
    %186 = arith.divf %184, %185 : vector<8x1xf32>
    %187 = vector.broadcast %179 : vector<8x1xf32> to vector<8x8xf32>
    %188 = arith.subf %175, %187 : vector<8x8xf32>
    %cst_89 = arith.constant 9.99999974E-6 : f32
    %189 = vector.broadcast %cst_89 : f32 to vector<8x1xf32>
    %190 = arith.addf %186, %189 : vector<8x1xf32>
    %191 = math.rsqrt %190 : vector<8x1xf32>
    %192 = vector.broadcast %191 : vector<8x1xf32> to vector<8x8xf32>
    %193 = arith.mulf %188, %192 : vector<8x8xf32>
    %194 = vector.extract_strided_slice %78 {offsets = [1, 0], sizes = [1, 8], strides = [1, 1]} : vector<4x8xf32> to vector<1x8xf32>
    %195 = vector.broadcast %194 : vector<1x8xf32> to vector<8x8xf32>
    %196 = arith.mulf %193, %195 : vector<8x8xf32>
    %197 = vector.extract_strided_slice %80 {offsets = [1, 0], sizes = [1, 8], strides = [1, 1]} : vector<4x8xf32> to vector<1x8xf32>
    %198 = vector.broadcast %197 : vector<1x8xf32> to vector<8x8xf32>
    %199 = arith.addf %196, %198 : vector<8x8xf32>
    %c0_90 = arith.constant 0 : index
    %c8 = arith.constant 8 : index
    %200 = vector.load %arg13[%c0_90, %c8] : memref<8x32xf32, #tpu.memory_space<vmem>>, vector<8x8xf32>
    tpu.vector_store %arg13[%c0_90, %c8], %199 {strides = array<i32>} : memref<8x32xf32, #tpu.memory_space<vmem>>, vector<8x8xf32>,
    %c2_91 = arith.constant 2 : index
    %c0_92 = arith.constant 0 : index
    %c0_93 = arith.constant 0 : index
    %201 = vector.load %arg12[%c2_91, %c0_92, %c0_93] : memref<4x8x8xf32, #tpu.memory_space<vmem>>, vector<1x8x8xf32>
    %202 = vector.shape_cast %201 : vector<1x8x8xf32> to vector<8x8xf32>
    %c0_94 = arith.constant 0 : index
    %c2_95 = arith.constant 2 : index
    %c0_96 = arith.constant 0 : index
    %c0_97 = arith.constant 0 : index
    %203 = vector.load %arg8[%c0_94, %c2_95, %c0_96, %c0_97] : memref<2x4x8x1xf32, #tpu.memory_space<vmem>>, vector<1x1x8x1xf32>
    %204 = vector.shape_cast %203 : vector<1x1x8x1xf32> to vector<8x1xf32>
    %c1_98 = arith.constant 1 : index
    %c2_99 = arith.constant 2 : index
    %c0_100 = arith.constant 0 : index
    %c0_101 = arith.constant 0 : index
    %205 = vector.load %arg8[%c1_98, %c2_99, %c0_100, %c0_101] : memref<2x4x8x1xf32, #tpu.memory_space<vmem>>, vector<1x1x8x1xf32>
    %206 = vector.shape_cast %205 : vector<1x1x8x1xf32> to vector<8x1xf32>
    %207 = vector.extract_strided_slice %62 {offsets = [0, 16], sizes = [8, 8], strides = [1, 1]} : vector<8x32xbf16> to vector<8x8xbf16>
    %208 = vector.extract_strided_slice %67 {offsets = [0, 16], sizes = [8, 8], strides = [1, 1]} : vector<8x32xbf16> to vector<8x8xbf16>
    %209 = vector.extract_strided_slice %66 {offsets = [0, 16], sizes = [8, 8], strides = [1, 1]} : vector<8x32xbf16> to vector<8x8xbf16>
    %210 = vector.extract_strided_slice %68 {offsets = [0, 16], sizes = [8, 8], strides = [1, 1]} : vector<8x32xbf16> to vector<8x8xbf16>
    %211 = vector.broadcast %204 : vector<8x1xf32> to vector<8x8xf32>
    %212 = arith.mulf %202, %211 : vector<8x8xf32>
    %213 = arith.truncf %212 : vector<8x8xf32> to vector<8x8xbf16>
    %cst_102 = arith.constant dense<0.000000e+00> : vector<8x8xf32>
    %214 = tpu.matmul %207, %213, %cst_102 {dimension_numbers = #tpu.dot_dimension_numbers<[1], [0], [0], [1], [0, 0, 1, 1], [], []>} : vector<8x8xbf16>, vector<8x8xbf16>, vector<8x8xf32> -> vector<8x8xf32>
    %cst_103 = arith.constant dense<0.000000e+00> : vector<8x8xf32>
    %215 = tpu.matmul %207, %208, %cst_103 {dimension_numbers = #tpu.dot_dimension_numbers<[1], [1], [0], [0], [0, 0, 1, 0], [], []>} : vector<8x8xbf16>, vector<8x8xbf16>, vector<8x8xf32> -> vector<8x8xf32>
    %216 = vector.extract_strided_slice %71 {offsets = [0, 16], sizes = [8, 8], strides = [1, 1]} : vector<8x32xf32> to vector<8x8xf32>
    %cst_104 = arith.constant dense<0.000000e+00> : vector<8xf32>
    %217 = vector.multi_reduction <add>, %216, %cst_104 [1] : vector<8x8xf32> to vector<8xf32>
    %218 = vector.shape_cast %217 : vector<8xf32> to vector<8x1xf32>
    %cst_105 = arith.constant 0.000000e+00 : f32
    %219 = vector.shape_cast %218 : vector<8x1xf32> to vector<8x1xf32>
    %220 = vector.broadcast %219 : vector<8x1xf32> to vector<8x8xf32>
    %221 = vector.broadcast %cst_105 : f32 to vector<8x8xf32>
    %222 = arith.select %75, %220, %221 : vector<8x8xi1>, vector<8x8xf32>
    %223 = arith.select %74, %215, %222 : vector<8x8xi1>, vector<8x8xf32>
    %224 = arith.truncf %223 : vector<8x8xf32> to vector<8x8xbf16>
    %cst_106 = arith.constant dense<0.000000e+00> : vector<8x8xf32>
    %225 = tpu.matmul %224, %210, %cst_106 {dimension_numbers = #tpu.dot_dimension_numbers<[1], [0], [0], [1], [0, 0, 1, 1], [], []>} : vector<8x8xbf16>, vector<8x8xbf16>, vector<8x8xf32> -> vector<8x8xf32>
    %226 = arith.addf %214, %225 : vector<8x8xf32>
    %227 = vector.broadcast %206 : vector<8x1xf32> to vector<8x8xf32>
    %228 = arith.mulf %227, %202 : vector<8x8xf32>
    %cst_107 = arith.constant dense<0.000000e+00> : vector<8x8xf32>
    %229 = tpu.matmul %209, %210, %cst_107 {dimension_numbers = #tpu.dot_dimension_numbers<[0], [0], [1], [1], [0, 1, 1, 1], [], []>} : vector<8x8xbf16>, vector<8x8xbf16>, vector<8x8xf32> -> vector<8x8xf32>
    %230 = arith.addf %228, %229 : vector<8x8xf32>
    %c2_108 = arith.constant 2 : index
    %c0_109 = arith.constant 0 : index
    %c0_110 = arith.constant 0 : index
    %231 = vector.load %arg12[%c2_108, %c0_109, %c0_110] : memref<4x8x8xf32, #tpu.memory_space<vmem>>, vector<1x8x8xf32>
    %232 = vector.shape_cast %231 : vector<1x8x8xf32> to vector<8x8xf32>
    %233 = vector.shape_cast %230 : vector<8x8xf32> to vector<1x8x8xf32>
    tpu.vector_store %arg12[%c2_108, %c0_109, %c0_110], %233 {strides = array<i32>} : memref<4x8x8xf32, #tpu.memory_space<vmem>>, vector<1x8x8xf32>,
    %cst_111 = arith.constant 1.250000e-01 : f32
    %234 = vector.broadcast %cst_111 : f32 to vector<8x8xf32>
    %235 = arith.mulf %226, %234 : vector<8x8xf32>
    %cst_112 = arith.constant dense<0.000000e+00> : vector<8xf32>
    %236 = vector.multi_reduction <add>, %235, %cst_112 [1] : vector<8x8xf32> to vector<8xf32>
    %237 = vector.shape_cast %236 : vector<8xf32> to vector<8x1xf32>
    %cst_113 = arith.constant 8.000000e+00 : f32
    %238 = vector.broadcast %cst_113 : f32 to vector<8x1xf32>
    %239 = arith.divf %237, %238 : vector<8x1xf32>
    %240 = vector.broadcast %239 : vector<8x1xf32> to vector<8x8xf32>
    %241 = arith.subf %235, %240 : vector<8x8xf32>
    %242 = arith.mulf %241, %241 : vector<8x8xf32>
    %cst_114 = arith.constant dense<0.000000e+00> : vector<8xf32>
    %243 = vector.multi_reduction <add>, %242, %cst_114 [1] : vector<8x8xf32> to vector<8xf32>
    %244 = vector.shape_cast %243 : vector<8xf32> to vector<8x1xf32>
    %cst_115 = arith.constant 8.000000e+00 : f32
    %245 = vector.broadcast %cst_115 : f32 to vector<8x1xf32>
    %246 = arith.divf %244, %245 : vector<8x1xf32>
    %247 = vector.broadcast %239 : vector<8x1xf32> to vector<8x8xf32>
    %248 = arith.subf %235, %247 : vector<8x8xf32>
    %cst_116 = arith.constant 9.99999974E-6 : f32
    %249 = vector.broadcast %cst_116 : f32 to vector<8x1xf32>
    %250 = arith.addf %246, %249 : vector<8x1xf32>
    %251 = math.rsqrt %250 : vector<8x1xf32>
    %252 = vector.broadcast %251 : vector<8x1xf32> to vector<8x8xf32>
    %253 = arith.mulf %248, %252 : vector<8x8xf32>
    %254 = vector.extract_strided_slice %78 {offsets = [2, 0], sizes = [1, 8], strides = [1, 1]} : vector<4x8xf32> to vector<1x8xf32>
    %255 = vector.broadcast %254 : vector<1x8xf32> to vector<8x8xf32>
    %256 = arith.mulf %253, %255 : vector<8x8xf32>
    %257 = vector.extract_strided_slice %80 {offsets = [2, 0], sizes = [1, 8], strides = [1, 1]} : vector<4x8xf32> to vector<1x8xf32>
    %258 = vector.broadcast %257 : vector<1x8xf32> to vector<8x8xf32>
    %259 = arith.addf %256, %258 : vector<8x8xf32>
    %c0_117 = arith.constant 0 : index
    %c16 = arith.constant 16 : index
    %260 = vector.load %arg13[%c0_117, %c16] : memref<8x32xf32, #tpu.memory_space<vmem>>, vector<8x8xf32>
    tpu.vector_store %arg13[%c0_117, %c16], %259 {strides = array<i32>} : memref<8x32xf32, #tpu.memory_space<vmem>>, vector<8x8xf32>,
    %c3_118 = arith.constant 3 : index
    %c0_119 = arith.constant 0 : index
    %c0_120 = arith.constant 0 : index
    %261 = vector.load %arg12[%c3_118, %c0_119, %c0_120] : memref<4x8x8xf32, #tpu.memory_space<vmem>>, vector<1x8x8xf32>
    %262 = vector.shape_cast %261 : vector<1x8x8xf32> to vector<8x8xf32>
    %c0_121 = arith.constant 0 : index
    %c3_122 = arith.constant 3 : index
    %c0_123 = arith.constant 0 : index
    %c0_124 = arith.constant 0 : index
    %263 = vector.load %arg8[%c0_121, %c3_122, %c0_123, %c0_124] : memref<2x4x8x1xf32, #tpu.memory_space<vmem>>, vector<1x1x8x1xf32>
    %264 = vector.shape_cast %263 : vector<1x1x8x1xf32> to vector<8x1xf32>
    %c1_125 = arith.constant 1 : index
    %c3_126 = arith.constant 3 : index
    %c0_127 = arith.constant 0 : index
    %c0_128 = arith.constant 0 : index
    %265 = vector.load %arg8[%c1_125, %c3_126, %c0_127, %c0_128] : memref<2x4x8x1xf32, #tpu.memory_space<vmem>>, vector<1x1x8x1xf32>
    %266 = vector.shape_cast %265 : vector<1x1x8x1xf32> to vector<8x1xf32>
    %267 = vector.extract_strided_slice %62 {offsets = [0, 24], sizes = [8, 8], strides = [1, 1]} : vector<8x32xbf16> to vector<8x8xbf16>
    %268 = vector.extract_strided_slice %67 {offsets = [0, 24], sizes = [8, 8], strides = [1, 1]} : vector<8x32xbf16> to vector<8x8xbf16>
    %269 = vector.extract_strided_slice %66 {offsets = [0, 24], sizes = [8, 8], strides = [1, 1]} : vector<8x32xbf16> to vector<8x8xbf16>
    %270 = vector.extract_strided_slice %68 {offsets = [0, 24], sizes = [8, 8], strides = [1, 1]} : vector<8x32xbf16> to vector<8x8xbf16>
    %271 = vector.broadcast %264 : vector<8x1xf32> to vector<8x8xf32>
    %272 = arith.mulf %262, %271 : vector<8x8xf32>
    %273 = arith.truncf %272 : vector<8x8xf32> to vector<8x8xbf16>
    %cst_129 = arith.constant dense<0.000000e+00> : vector<8x8xf32>
    %274 = tpu.matmul %267, %273, %cst_129 {dimension_numbers = #tpu.dot_dimension_numbers<[1], [0], [0], [1], [0, 0, 1, 1], [], []>} : vector<8x8xbf16>, vector<8x8xbf16>, vector<8x8xf32> -> vector<8x8xf32>
    %cst_130 = arith.constant dense<0.000000e+00> : vector<8x8xf32>
    %275 = tpu.matmul %267, %268, %cst_130 {dimension_numbers = #tpu.dot_dimension_numbers<[1], [1], [0], [0], [0, 0, 1, 0], [], []>} : vector<8x8xbf16>, vector<8x8xbf16>, vector<8x8xf32> -> vector<8x8xf32>
    %276 = vector.extract_strided_slice %71 {offsets = [0, 24], sizes = [8, 8], strides = [1, 1]} : vector<8x32xf32> to vector<8x8xf32>
    %cst_131 = arith.constant dense<0.000000e+00> : vector<8xf32>
    %277 = vector.multi_reduction <add>, %276, %cst_131 [1] : vector<8x8xf32> to vector<8xf32>
    %278 = vector.shape_cast %277 : vector<8xf32> to vector<8x1xf32>
    %cst_132 = arith.constant 0.000000e+00 : f32
    %279 = vector.shape_cast %278 : vector<8x1xf32> to vector<8x1xf32>
    %280 = vector.broadcast %279 : vector<8x1xf32> to vector<8x8xf32>
    %281 = vector.broadcast %cst_132 : f32 to vector<8x8xf32>
    %282 = arith.select %75, %280, %281 : vector<8x8xi1>, vector<8x8xf32>
    %283 = arith.select %74, %275, %282 : vector<8x8xi1>, vector<8x8xf32>
    %284 = arith.truncf %283 : vector<8x8xf32> to vector<8x8xbf16>
    %cst_133 = arith.constant dense<0.000000e+00> : vector<8x8xf32>
    %285 = tpu.matmul %284, %270, %cst_133 {dimension_numbers = #tpu.dot_dimension_numbers<[1], [0], [0], [1], [0, 0, 1, 1], [], []>} : vector<8x8xbf16>, vector<8x8xbf16>, vector<8x8xf32> -> vector<8x8xf32>
    %286 = arith.addf %274, %285 : vector<8x8xf32>
    %287 = vector.broadcast %266 : vector<8x1xf32> to vector<8x8xf32>
    %288 = arith.mulf %287, %262 : vector<8x8xf32>
    %cst_134 = arith.constant dense<0.000000e+00> : vector<8x8xf32>
    %289 = tpu.matmul %269, %270, %cst_134 {dimension_numbers = #tpu.dot_dimension_numbers<[0], [0], [1], [1], [0, 1, 1, 1], [], []>} : vector<8x8xbf16>, vector<8x8xbf16>, vector<8x8xf32> -> vector<8x8xf32>
    %290 = arith.addf %288, %289 : vector<8x8xf32>
    %c3_135 = arith.constant 3 : index
    %c0_136 = arith.constant 0 : index
    %c0_137 = arith.constant 0 : index
    %291 = vector.load %arg12[%c3_135, %c0_136, %c0_137] : memref<4x8x8xf32, #tpu.memory_space<vmem>>, vector<1x8x8xf32>
    %292 = vector.shape_cast %291 : vector<1x8x8xf32> to vector<8x8xf32>
    %293 = vector.shape_cast %290 : vector<8x8xf32> to vector<1x8x8xf32>
    tpu.vector_store %arg12[%c3_135, %c0_136, %c0_137], %293 {strides = array<i32>} : memref<4x8x8xf32, #tpu.memory_space<vmem>>, vector<1x8x8xf32>,
    %cst_138 = arith.constant 1.250000e-01 : f32
    %294 = vector.broadcast %cst_138 : f32 to vector<8x8xf32>
    %295 = arith.mulf %286, %294 : vector<8x8xf32>
    %cst_139 = arith.constant dense<0.000000e+00> : vector<8xf32>
    %296 = vector.multi_reduction <add>, %295, %cst_139 [1] : vector<8x8xf32> to vector<8xf32>
    %297 = vector.shape_cast %296 : vector<8xf32> to vector<8x1xf32>
    %cst_140 = arith.constant 8.000000e+00 : f32
    %298 = vector.broadcast %cst_140 : f32 to vector<8x1xf32>
    %299 = arith.divf %297, %298 : vector<8x1xf32>
    %300 = vector.broadcast %299 : vector<8x1xf32> to vector<8x8xf32>
    %301 = arith.subf %295, %300 : vector<8x8xf32>
    %302 = arith.mulf %301, %301 : vector<8x8xf32>
    %cst_141 = arith.constant dense<0.000000e+00> : vector<8xf32>
    %303 = vector.multi_reduction <add>, %302, %cst_141 [1] : vector<8x8xf32> to vector<8xf32>
    %304 = vector.shape_cast %303 : vector<8xf32> to vector<8x1xf32>
    %cst_142 = arith.constant 8.000000e+00 : f32
    %305 = vector.broadcast %cst_142 : f32 to vector<8x1xf32>
    %306 = arith.divf %304, %305 : vector<8x1xf32>
    %307 = vector.broadcast %299 : vector<8x1xf32> to vector<8x8xf32>
    %308 = arith.subf %295, %307 : vector<8x8xf32>
    %cst_143 = arith.constant 9.99999974E-6 : f32
    %309 = vector.broadcast %cst_143 : f32 to vector<8x1xf32>
    %310 = arith.addf %306, %309 : vector<8x1xf32>
    %311 = math.rsqrt %310 : vector<8x1xf32>
    %312 = vector.broadcast %311 : vector<8x1xf32> to vector<8x8xf32>
    %313 = arith.mulf %308, %312 : vector<8x8xf32>
    %314 = vector.extract_strided_slice %78 {offsets = [3, 0], sizes = [1, 8], strides = [1, 1]} : vector<4x8xf32> to vector<1x8xf32>
    %315 = vector.broadcast %314 : vector<1x8xf32> to vector<8x8xf32>
    %316 = arith.mulf %313, %315 : vector<8x8xf32>
    %317 = vector.extract_strided_slice %80 {offsets = [3, 0], sizes = [1, 8], strides = [1, 1]} : vector<4x8xf32> to vector<1x8xf32>
    %318 = vector.broadcast %317 : vector<1x8xf32> to vector<8x8xf32>
    %319 = arith.addf %316, %318 : vector<8x8xf32>
    %c0_144 = arith.constant 0 : index
    %c24 = arith.constant 24 : index
    %320 = vector.load %arg13[%c0_144, %c24] : memref<8x32xf32, #tpu.memory_space<vmem>>, vector<8x8xf32>
    tpu.vector_store %arg13[%c0_144, %c24], %319 {strides = array<i32>} : memref<8x32xf32, #tpu.memory_space<vmem>>, vector<8x8xf32>,
    %c0_145 = arith.constant 0 : index
    %c0_146 = arith.constant 0 : index
    %321 = vector.load %arg13[%c0_145, %c0_146] : memref<8x32xf32, #tpu.memory_space<vmem>>, vector<8x32xf32>
    %322 = arith.mulf %321, %54 : vector<8x32xf32>
    %323 = arith.truncf %322 : vector<8x32xf32> to vector<8x32xbf16>
    %c0_147 = arith.constant 0 : index
    %c0_148 = arith.constant 0 : index
    %324 = vector.load %arg5[%c0_147, %c0_148] : memref<32x32xbf16, #tpu.memory_space<vmem>>, vector<32x32xbf16>
    %cst_149 = arith.constant dense<0.000000e+00> : vector<8x32xf32>
    %325 = tpu.matmul %323, %324, %cst_149 {dimension_numbers = #tpu.dot_dimension_numbers<[1], [0], [0], [1], [0, 0, 1, 1], [], []>} : vector<8x32xbf16>, vector<32x32xbf16>, vector<8x32xf32> -> vector<8x32xf32>
    %c0_150 = arith.constant 0 : index
    %c0_151 = arith.constant 0 : index
    %c0_152 = arith.constant 0 : index
    %326 = vector.load %arg10[%c0_150, %c0_151, %c0_152] : memref<1x8x32xf32, #tpu.memory_space<vmem>>, vector<1x8x32xf32>
    %327 = vector.shape_cast %326 : vector<1x8x32xf32> to vector<8x32xf32>
    %328 = vector.shape_cast %325 : vector<8x32xf32> to vector<1x8x32xf32>
    tpu.vector_store %arg10[%c0_150, %c0_151, %c0_152], %328 {strides = array<i32>} : memref<1x8x32xf32, #tpu.memory_space<vmem>>, vector<1x8x32xf32>,
    return
  }
  func.func @transform_0(%arg0: i32, %arg1: i32) -> (i32, i32, i32) {
    %c0_i32 = arith.constant 0 : i32
    %c0_i32_0 = arith.constant 0 : i32
    return %arg0, %arg1, %c0_i32 : i32, i32, i32
  }
  func.func @transform_1(%arg0: i32, %arg1: i32) -> (i32, i32) {
    %c0_i32 = arith.constant 0 : i32
    %c0_i32_0 = arith.constant 0 : i32
    %c0_i32_1 = arith.constant 0 : i32
    return %c0_i32, %c0_i32_0 : i32, i32
  }
  func.func @transform_2(%arg0: i32, %arg1: i32) -> (i32, i32, i32) {
    %c0_i32 = arith.constant 0 : i32
    %c0_i32_0 = arith.constant 0 : i32
    %c0_i32_1 = arith.constant 0 : i32
    %c0_i32_2 = arith.constant 0 : i32
    return %c0_i32, %c0_i32_0, %c0_i32_1 : i32, i32, i32
  }
  func.func @transform_3(%arg0: i32, %arg1: i32) -> (i32, i32) {
    %c0_i32 = arith.constant 0 : i32
    %c0_i32_0 = arith.constant 0 : i32
    %c0_i32_1 = arith.constant 0 : i32
    return %c0_i32, %c0_i32_0 : i32, i32
  }
  func.func @transform_4(%arg0: i32, %arg1: i32) -> (i32, i32, i32) {
    %c0_i32 = arith.constant 0 : i32
    %c0_i32_0 = arith.constant 0 : i32
    %c0_i32_1 = arith.constant 0 : i32
    %c0_i32_2 = arith.constant 0 : i32
    return %c0_i32, %c0_i32_0, %c0_i32_1 : i32, i32, i32
  }
  func.func @transform_5(%arg0: i32, %arg1: i32) -> (i32, i32) {
    %c0_i32 = arith.constant 0 : i32
    %c0_i32_0 = arith.constant 0 : i32
    %c0_i32_1 = arith.constant 0 : i32
    return %c0_i32, %c0_i32_0 : i32, i32
  }
  func.func @transform_6(%arg0: i32, %arg1: i32) -> (i32, i32, i32, i32) {
    %c0_i32 = arith.constant 0 : i32
    %c0_i32_0 = arith.constant 0 : i32
    %c0_i32_1 = arith.constant 0 : i32
    %c0_i32_2 = arith.constant 0 : i32
    %c0_i32_3 = arith.constant 0 : i32
    return %c0_i32, %c0_i32_0, %c0_i32_1, %c0_i32_2 : i32, i32, i32, i32
  }
  func.func @transform_7(%arg0: i32, %arg1: i32) -> (i32, i32, i32) {
    %c0_i32 = arith.constant 0 : i32
    %c0_i32_0 = arith.constant 0 : i32
    %c0_i32_1 = arith.constant 0 : i32
    %c0_i32_2 = arith.constant 0 : i32
    return %c0_i32, %c0_i32_0, %c0_i32_1 : i32, i32, i32
  }
  func.func @transform_8(%arg0: i32, %arg1: i32) -> (i32, i32, i32) {
    %c0_i32 = arith.constant 0 : i32
    %c0_i32_0 = arith.constant 0 : i32
    return %arg0, %arg1, %c0_i32 : i32, i32, i32
  }
}

</mosaic_0001>

<bundles_post_ra>
// kernel: tpu_custom_call.1
= control target key start
LH: loop header
LB: loop body
LE: loop exit
PB: predicated region body
PF: predicated region fallthrough
CT: control target
= control target key end

     0   :  { %s3495_s0 = inlined_call_operand.hbm [shape: f32[2,8,32], index: 0, kind: input, shape index: {}]   ;;  %s3496_s1 = inlined_call_operand.hbm [shape: f32[4,32], index: 1, kind: input, shape index: {}]   ;;  %s3497_s2 = inlined_call_operand.hbm [shape: bf16[4,32,32], index: 2, kind: input, shape index: {}]   ;;  %s3498_s3 = inlined_call_operand.hbm [shape: bf16[32,32], index: 3, kind: input, shape index: {}]   ;;  %s3499_s4 = inlined_call_operand.hbm [shape: f32[2,8,32], index: 4, kind: input, shape index: {}]   ;;  %s3500_s5 = inlined_call_operand.hbm [shape: f32[2,32], index: 5, kind: input, shape index: {}]   ;;  %s3501_s6 = inlined_call_operand.hbm [shape: f32[2,4,8,1], index: 6, kind: input, shape index: {}]   ;;  %s3502_s7 = inlined_call_operand.hbm [shape: f32[2,4,8], index: 7, kind: input, shape index: {}]   ;;  %s3503_s8 = inlined_call_operand.hbm [shape: f32[2,8,32], index: 8, kind: output, shape index: {}]  }
   0x1   :  { %3514 = sst [smem:[#allocation27_spill]] %s3496_s1 }
   0x2   :  { %3515 = sst [smem:[#allocation28_spill]] %s3497_s2 }
   0x3   :  { %3516 = sst [smem:[#allocation29_spill]] %s3498_s3 }
   0x4   :  { %3517 = sst [smem:[#allocation30_spill]] %s3500_s5 }
   0x5   :  { %3518 = sst [smem:[#allocation31_spill]] %s3503_s8 }
   0x6   :  { %13 = vsyncpa [#allocation6], 0 }
   0x7   :  { %15 = vsyncpa [#allocation6 + $0x1], 0 }
   0x8   :  { %16 = vsyncpa [#allocation9], 0 }
   0x9   :  { %17 = vsyncpa [#allocation12], 0 }
   0xa   :  { %18 = vsyncpa [#allocation15], 0 }
   0xb   :  { %19 = vsyncpa [#allocation18], 0 }
   0xc   :  { %20 = vsyncpa [#allocation7], 0 }
   0xd   :  { %22 = vsyncpa [#allocation7 + $0x1], 0  ;;  %s2858_s27 = smov 0   ;;  %s2860_s28 = smov 0  }
   0xe   :  { %s2862_s29 = smov 0   ;;  %s2864_s30 = smov 0  }
   0xf   :  { %s2866_s9 = smov 0   ;;  %s2868_s10 = smov 0  }
  0x10 LB: > { %3519 = sst [smem:[#allocation26_spill]] %s2781_s30  ;;  %s3507_s11 = sadd.s32 4294967295, %s2789_s10   ;;  %s2789_s10 = sphi %s2868_s10, %s28_s10   ;;  %s2785_s9 = sphi %s2866_s9, %s3548_s9   ;;  %s2781_s30 = sphi %s2864_s30, %s3547_s30   ;;  %s2777_s29 = sphi %s2862_s29, %s3546_s29   ;;  %s2773_s28 = sphi %s2860_s28, %s3545_s28   ;;  %s2769_s27 = sphi %s2858_s27, %s3544_s27  }
  0x11   : > { %p2036_p0 = scmp.ge.s32.totalorder %s2789_s10, 1  ;;  %p2892_p1 = scmp.eq.s32.totalorder %s3507_s11, 0 }
  0x12   : > { %p248_p2 = scmp.lt.s32.totalorder %s2789_s10, 3  ;;  %s2791_s14 = smov [#allocation8]  }
  0x13   : > { %s3520_s12 = scalar_select %p2892_p1, 1, 0 }
  0x14   : > { %p2897_p3 = pnand %p2036_p0, %p248_p2  ;;  %s261_s15 = sshll.u32 %s2791_s14, 4  ;;  %s262_s15 = int_to_ptr.vmem [resolvable:$true] %s261_s15 }
  0x15   : > { %s2792_s17 = smov [#allocation11]   ;;  %s2793_s19 = smov [#allocation14]  }
  0x16   : > { %s3521_s13 = scalar_select %p2897_p3, 1, 0 }
  0x17   : > { %p2327_p5 = pneg %p2897_p3  ;;  %s284_s18 = sshll.u32 %s2792_s17, 4  ;;  %s2910_s18 = int_to_ptr.vmem [resolvable:$true] %s284_s18 }
  0x18   : > { %s2912_s20 = sshll.u32 %s2793_s19, 4  ;;  %s3523_s1 = sld [smem:[#allocation27_spill]]  ;;  %s312_s20 = int_to_ptr.vmem [resolvable:$true] %s2912_s20 }
  0x19   : > { %p2906_p6 = pnand %p2327_p5, %p2892_p1 }
  0x1b   : > { %p2922_p8 = pneg %p2906_p6 }
  0x1e   : > { %s2465_s23 = scalar_lea.hbm %s3523_s1, 64 }
  0x1f   : > { %p2466_p7 = scmp.ne.s32.totalorder %s3523_s1, %s2465_s23  ;;  %p2472_p11 = scmp.lt.u32.totalorder %s2465_s23, %s3523_s1 }
  0x21   : > { %p2468_p9 = pnand %p2922_p8, %p2466_p7 }
  0x23   : > { %p2469_p10 = pneg %p2468_p9 }
  0x25   : > { %p2474_p12 = pnand %p2472_p11, %p2469_p10 }
  0x27   : > { %2477 = shalt.err (!%p2474_p12)
}
  0x28   : > { %s2478_s19 = scalar_lea.vmem %s262_s15, 64  ;;  %p2486_p5 = scmp.lt.s32.totalorder %s262_s15, %s262_s15 }
  0x29   : > { %p2479_p13 = scmp.ne.s32.totalorder %s262_s15, %s2478_s19  ;;  %p2487_p4 = scmp.lt.s32.totalorder %s2478_s19, %s2478_s19 }
  0x2b   : > { %p2481_p0 = pnand %p2479_p13, %p2922_p8  ;;  %p2488_p3 = por %p2487_p4, %p2486_p5 }
  0x2d   : > { %p2482_p2 = pneg %p2481_p0 }
  0x2f   : > { %p2489_p1 = pnand %p2488_p3, %p2482_p2 }
  0x31   : > { %2492 = shalt.err (!%p2489_p1)
}
  0x32   : > { %2330 = dma.hbm_to_vmem [thread:$0]  (!%p2906_p6), %s3523_s1, 64, %s262_s15, [#allocation9]  }
  0x33   : > { %s3525_s3 = sld [smem:[#allocation29_spill]] }
  0x39   : > { %s2493_s25 = scalar_lea.hbm %s3525_s3, 256 }
  0x3a   : > { %p2494_p7 = scmp.ne.s32.totalorder %s3525_s3, %s2493_s25  ;;  %p2500_p1 = scmp.lt.u32.totalorder %s2493_s25, %s3525_s3 }
  0x3c   : > { %p2496_p9 = pnand %p2494_p7, %p2922_p8 }
  0x3e   : > { %p2497_p4 = pneg %p2496_p9 }
  0x40   : > { %p2502_p3 = pnand %p2500_p1, %p2497_p4 }
  0x42   : > { %2505 = shalt.err (!%p2502_p3)
}
  0x43   : > { %s2506_s15 = scalar_lea.vmem %s2910_s18, 256  ;;  %p2514_p13 = scmp.lt.s32.totalorder %s2910_s18, %s2910_s18 }
  0x44   : > { %p2507_p10 = scmp.ne.s32.totalorder %s2910_s18, %s2506_s15  ;;  %p2515_p0 = scmp.lt.s32.totalorder %s2506_s15, %s2506_s15 }
  0x46   : > { %p2509_p11 = pnand %p2507_p10, %p2922_p8  ;;  %p2516_p2 = por %p2515_p0, %p2514_p13 }
  0x48   : > { %p2510_p12 = pneg %p2509_p11 }
  0x4a   : > { %p2517_p5 = pnand %p2516_p2, %p2510_p12 }
  0x4c   : > { %2520 = shalt.err (!%p2517_p5)
}
  0x4d   : > { %s3508_s21 = smov 64   ;;  %s3510_s11 = smov 4  }
  0x4e   : > { %2336 = dma.hbm_to_vmem [thread:$0]  (!%p2906_p6), %s3525_s3, 256, %s2910_s18, [#allocation12], %s3508_s21, %s3508_s21, %s3510_s11  }
  0x4f   : > { %s3526_s5 = sld [smem:[#allocation30_spill]] }
  0x55   : > { %s2521_s14 = scalar_lea.hbm %s3526_s5, 32 }
  0x56   : > { %p2522_p7 = scmp.ne.s32.totalorder %s3526_s5, %s2521_s14  ;;  %p2528_p1 = scmp.lt.u32.totalorder %s2521_s14, %s3526_s5 }
  0x58   : > { %p2524_p9 = pnand %p2522_p7, %p2922_p8 }
  0x5a   : > { %p2525_p4 = pneg %p2524_p9 }
  0x5c   : > { %p2530_p3 = pnand %p2528_p1, %p2525_p4 }
  0x5e   : > { %2533 = shalt.err (!%p2530_p3)
}
  0x5f   : > { %s2534_s22 = scalar_lea.vmem %s312_s20, 32  ;;  %p2542_p13 = scmp.lt.s32.totalorder %s312_s20, %s312_s20 }
  0x60   : > { %p2535_p10 = scmp.ne.s32.totalorder %s312_s20, %s2534_s22  ;;  %p2543_p0 = scmp.lt.s32.totalorder %s2534_s22, %s2534_s22 }
  0x62   : > { %p2537_p11 = pnand %p2535_p10, %p2922_p8  ;;  %p2544_p2 = por %p2543_p0, %p2542_p13 }
  0x64   : > { %p2538_p12 = pneg %p2537_p11 }
  0x66   : > { %p2545_p5 = pnand %p2544_p2, %p2538_p12 }
  0x68   : > { %2548 = shalt.err (!%p2545_p5)
}
  0x69   : > { %2342 = dma.hbm_to_vmem [thread:$0]  (!%p2906_p6), %s3526_s5, 32, %s312_s20, [#allocation15]  }
  0x6a   : > { %s2796_s1 = smov [#allocation10]   ;;  %s2797_s25 = smov [#allocation13]  }
  0x6b   : > { %s271_s24 = sshll.u32 %s2796_s1, 4  ;;  %s297_s14 = sshll.u32 %s2797_s25, 4  ;;  %s272_s24 = int_to_ptr.vmem [resolvable:$true] %s271_s24  ;;  %s298_s14 = int_to_ptr.vmem [resolvable:$true] %s297_s14 }
  0x6c   : > { %s3527_s2 = sld [smem:[#allocation28_spill]] }
  0x72   : > { %s2549_s15 = scalar_lea.hbm %s3527_s2, 1024 }
  0x73   : > { %p2550_p7 = scmp.ne.s32.totalorder %s3527_s2, %s2549_s15  ;;  %p2556_p1 = scmp.lt.u32.totalorder %s2549_s15, %s3527_s2 }
  0x75   : > { %p2552_p9 = pnand %p2550_p7, %p2922_p8 }
  0x77   : > { %p2553_p4 = pneg %p2552_p9 }
  0x79   : > { %p2558_p3 = pnand %p2556_p1, %p2553_p4 }
  0x7b   : > { %2561 = shalt.err (!%p2558_p3)
}
  0x7c   : > { %s2562_s20 = scalar_lea.vmem %s272_s24, 1024  ;;  %p2570_p13 = scmp.lt.s32.totalorder %s272_s24, %s272_s24 }
  0x7d   : > { %p2563_p10 = scmp.ne.s32.totalorder %s272_s24, %s2562_s20  ;;  %p2571_p0 = scmp.lt.s32.totalorder %s2562_s20, %s2562_s20 }
  0x7f   : > { %p2565_p11 = pnand %p2563_p10, %p2922_p8  ;;  %p2572_p2 = por %p2571_p0, %p2570_p13 }
  0x81   : > { %p2566_p12 = pneg %p2565_p11 }
  0x83   : > { %p2573_p5 = pnand %p2572_p2, %p2566_p12 }
  0x85   : > { %2576 = shalt.err (!%p2573_p5)
}
  0x86   : > { %s3528_s21 = smov 4   ;;  %s3529_s23 = smov 64  }
  0x87   : > { %2333 = dma.hbm_to_vmem [thread:$0]  (!%p2906_p6), %s3527_s2, 1024, %s272_s24, [#allocation9], %s3529_s23, %s3529_s23, %s3528_s21  }
  0x88   : > { %s2577_s19 = scalar_lea.hbm %s3499_s4, 256 }
  0x89   : > { %p2578_p7 = scmp.ne.s32.totalorder %s3499_s4, %s2577_s19  ;;  %p2584_p1 = scmp.lt.u32.totalorder %s2577_s19, %s3499_s4 }
  0x8b   : > { %p2580_p9 = pnand %p2578_p7, %p2922_p8 }
  0x8d   : > { %p2581_p4 = pneg %p2580_p9 }
  0x8f   : > { %p2586_p3 = pnand %p2584_p1, %p2581_p4 }
  0x91   : > { %2589 = shalt.err (!%p2586_p3)
}
  0x92   : > { %s2590_s11 = scalar_lea.vmem %s298_s14, 256  ;;  %p2598_p13 = scmp.lt.s32.totalorder %s298_s14, %s298_s14 }
  0x93   : > { %p2591_p10 = scmp.ne.s32.totalorder %s298_s14, %s2590_s11  ;;  %p2599_p0 = scmp.lt.s32.totalorder %s2590_s11, %s2590_s11 }
  0x95   : > { %p2593_p11 = pnand %p2591_p10, %p2922_p8  ;;  %p2600_p2 = por %p2599_p0, %p2598_p13 }
  0x97   : > { %p2594_p12 = pneg %p2593_p11 }
  0x99   : > { %p2601_p5 = pnand %p2600_p2, %p2594_p12 }
  0x9b   : > { %2604 = shalt.err (!%p2601_p5)
}
  0x9c   : > { %s2798_s24 = smov 128   ;;  %s2799_s1 = smov 8  }
  0x9d   : > { %2339 = dma.hbm_to_vmem [thread:$0]  (!%p2906_p6), %s3499_s4, 256, %s298_s14, [#allocation12], %s2798_s24, %s2798_s24, %s2799_s1  }
  0x9e   : > { %s2800_s19 = smov [#allocation16]   ;;  %s2801_s22 = smov [#allocation17]  }
  0x9f   : > { %s321_s15 = sshll.u32 %s2800_s19, 4  ;;  %s334_s18 = sshll.u32 %s2801_s22, 4  ;;  %s322_s15 = int_to_ptr.vmem [resolvable:$true] %s321_s15  ;;  %s335_s18 = int_to_ptr.vmem [resolvable:$true] %s334_s18 }
  0xa0   : > { %s2605_s11 = scalar_lea.hbm %s3501_s6, 1024 }
  0xa1   : > { %p2606_p7 = scmp.ne.s32.totalorder %s3501_s6, %s2605_s11  ;;  %p2612_p1 = scmp.lt.u32.totalorder %s2605_s11, %s3501_s6 }
  0xa3   : > { %p2608_p9 = pnand %p2606_p7, %p2922_p8 }
  0xa5   : > { %p2609_p4 = pneg %p2608_p9 }
  0xa7   : > { %p2614_p3 = pnand %p2612_p1, %p2609_p4 }
  0xa9   : > { %2617 = shalt.err (!%p2614_p3)
}
  0xaa   : > { %s2618_s14 = scalar_lea.vmem %s322_s15, 1024  ;;  %p2626_p13 = scmp.lt.s32.totalorder %s322_s15, %s322_s15 }
  0xab   : > { %p2619_p10 = scmp.ne.s32.totalorder %s322_s15, %s2618_s14  ;;  %p2627_p0 = scmp.lt.s32.totalorder %s2618_s14, %s2618_s14 }
  0xad   : > { %p2621_p11 = pnand %p2619_p10, %p2922_p8  ;;  %p2628_p2 = por %p2627_p0, %p2626_p13 }
  0xaf   : > { %p2622_p12 = pneg %p2621_p11 }
  0xb1   : > { %p2629_p5 = pnand %p2628_p2, %p2622_p12 }
  0xb3   : > { %2632 = shalt.err (!%p2629_p5)
}
  0xb4   : > { %2345 = dma.hbm_to_vmem [thread:$0]  (!%p2906_p6), %s3501_s6, 1024, %s322_s15, [#allocation15], %s2798_s24, %s2798_s24, %s2799_s1  }
  0xb5   : > { %s2633_s30 = scalar_lea.hbm %s3502_s7, 128 }
  0xb6   : > { %p2634_p7 = scmp.ne.s32.totalorder %s3502_s7, %s2633_s30  ;;  %p2640_p1 = scmp.lt.u32.totalorder %s2633_s30, %s3502_s7 }
  0xb8   : > { %p2636_p9 = pnand %p2634_p7, %p2922_p8 }
  0xba   : > { %p2637_p4 = pneg %p2636_p9 }
  0xbc   : > { %p2642_p3 = pnand %p2640_p1, %p2637_p4 }
  0xbe   : > { %2645 = shalt.err (!%p2642_p3)
}
  0xbf   : > { %s2646_s20 = scalar_lea.vmem %s335_s18, 128  ;;  %p2654_p13 = scmp.lt.s32.totalorder %s335_s18, %s335_s18 }
  0xc0   : > { %p2647_p10 = scmp.ne.s32.totalorder %s335_s18, %s2646_s20  ;;  %p2655_p0 = scmp.lt.s32.totalorder %s2646_s20, %s2646_s20 }
  0xc2   : > { %p2649_p11 = pnand %p2647_p10, %p2922_p8  ;;  %p2656_p2 = por %p2655_p0, %p2654_p13 }
  0xc4   : > { %p2650_p12 = pneg %p2649_p11 }
  0xc6   : > { %p2657_p5 = pnand %p2656_p2, %p2650_p12 }
  0xc8   : > { %2660 = shalt.err (!%p2657_p5)
}
  0xc9   : > { %2348 = dma.hbm_to_vmem [thread:$0]  (!%p2906_p6), %s3502_s7, 128, %s335_s18, [#allocation18], %s3529_s23, %s3529_s23, %s3528_s21  }
  0xca   : > { %s2035_s16 = sadd.s32 4294967294, %s2789_s10   ;;  %s40_s26 = sadd.s32 1, %s2785_s9 }
  0xcb   : > { %s49_s15 = sadd.s32 1, %s2777_s29  ;;  %p42_p8 = scmp.ge.s32.totalorder %s40_s26, 2 }
  0xcc   : > { %p56_p7 = scmp.ne.s32.totalorder %s2777_s29, %s2773_s28  ;;  %p57_p9 = scmp.eq.s32.totalorder %s2789_s10, 0 }
  0xcd   : > { %p62_p4 = scmp.ne.s32.totalorder %s2773_s28, %s2769_s27  ;;  %s3550_s26 = smov (%p42_p8, %s40_s26), 0 }
  0xce   : > { %p3071_p1 = por %p57_p9, %p56_p7  ;;  %p3531_p3 = scmp.ne.s32.totalorder %s3520_s12, 0 }
  0xcf   : > { %s44_s23 = ssub.s32 %s2785_s9, %s3550_s26  ;;  %s3533_s18 = sadd.s32 4294967295, %s2789_s10  }
  0xd0   : > { %p3077_p6 = por %p3531_p3, %p62_p4  ;;  %p235_p10 = scmp.eq.s32.totalorder %s3533_s18, 1 }
  0xd1   : > { %p47_p11 = scmp.eq.s32.totalorder %s44_s23, 0  ;;  %p241_p12 = scmp.eq.s32.totalorder %s2035_s16, 1 }
  0xd2   : > { %p3085_p13 = por %p235_p10, %p56_p7  ;;  %p2364_p0 = scmp.lt.s32.totalorder %s2789_s10, 2 }
  0xd3   : > { %s3091_s2 = scalar_select %p47_p11, %s2777_s29, %s49_s15  }
  0xd4   : > { %s3534_s14 = scalar_select %p3085_p13, 1, 0 }
  0xd5   : > { %p3093_p2 = por %p241_p12, %p62_p4  ;;  %s348_s5 = sand.u32 1, %s2777_s29  }
  0xd6   : > { %s2045_s8 = sshll.u32 %s348_s5, 3  ;;  %s2046_s30 = sshll.u32 %s2785_s9, 7 }
  0xd7   : > { %s3535_s3 = scalar_select %p3093_p2, 1, 0 }
  0xd8   : > { %s3102_s19 = scalar_lea.hbm %s3495_s0, %s2046_s30  ;;  %s352_s22 = scalar_lea.vmem [#allocation5], %s2045_s8 }
  0xd9   : > { %s360_s20 = sshll.u32 %s352_s22, 4  ;;  %p3108_p5 = pnand %p2364_p0, %p3071_p1  ;;  %s3104_s20 = int_to_ptr.vmem [resolvable:$true] %s360_s20 }
  0xda   : > { %s349_s1 = scalar_lea.sflag [#allocation6], %s348_s5  ;;  %s2661_s16 = scalar_lea.hbm %s3102_s19, 128 }
  0xdb   : > { %p2662_p8 = scmp.ne.s32.totalorder %s3102_s19, %s2661_s16  ;;  %p2663_p7 = pneg %p3108_p5 }
  0xdc   : > { %s2666_s18 = scalar_lea.hbm %s3495_s0, 256  ;;  %p2667_p1 = scmp.lt.u32.totalorder %s3102_s19, %s3495_s0 }
  0xdd   : > { %p2664_p9 = pnand %p2663_p7, %p2662_p8  ;;  %p2668_p3 = scmp.lt.u32.totalorder %s2666_s18, %s2661_s16 }
  0xde   : > { %p2670_p11 = scmp.lt.u32.totalorder %s2661_s16, %s3102_s19 }
  0xdf   : > { %p2665_p4 = pneg %p2664_p9  ;;  %p2669_p10 = por %p2668_p3, %p2667_p1 }
  0xe1   : > { %p2671_p12 = por %p2670_p11, %p2669_p10 }
  0xe3   : > { %p2672_p0 = pnand %p2671_p12, %p2665_p4 }
  0xe5   : > { %2675 = shalt.err (!%p2672_p0)
}
  0xe6   : > { %s2676_s5 = scalar_lea.vmem %s3104_s20, 128  ;;  %s2802_s30 = smov [#allocation5]  }
  0xe7   : > { %p2677_p8 = scmp.ne.s32.totalorder %s3104_s20, %s2676_s5  ;;  %s2681_s25 = sshll.u32 %s2802_s30, 4  ;;  %s2682_s25 = int_to_ptr.vmem [resolvable:$false] %s2681_s25 }
  0xe8   : > { %s2683_s17 = scalar_lea.vmem %s2682_s25, 256  ;;  %p2684_p13 = scmp.lt.s32.totalorder %s3104_s20, %s2682_s25 }
  0xe9   : > { %p2679_p9 = pnand %p2677_p8, %p2663_p7  ;;  %p2685_p1 = scmp.lt.s32.totalorder %s2683_s17, %s2676_s5 }
  0xeb   : > { %p2680_p2 = pneg %p2679_p9  ;;  %p2686_p3 = por %p2685_p1, %p2684_p13 }
  0xed   : > { %p2687_p10 = pnand %p2686_p3, %p2680_p2 }
  0xef   : > { %2690 = shalt.err (!%p2687_p10)
}
  0xf0   : > { %2352 = dma.hbm_to_vmem [thread:$0]  (!%p3108_p5), %s3102_s19, 128, %s3104_s20, %s349_s1  }
  0xf1   : > { %p3537_p4 = scmp.ne.s32.totalorder %s3521_s13, 0 }
  0xf2   : > { %s3140_s22 = sand.u32 (!%p3537_p4), 1, %s2773_s28  }
  0xf3   : > { %369 = sbr.rel (%p3537_p4) target bundleno = 1850 (0x73a), region = 52  ;;  %s2048_s16 = sshll.u32 (!%p3537_p4), %s3140_s22, 3 }
  0xf4   : > { %s372_s15 = scalar_lea.sflag (!%p3537_p4), [#allocation6], %s3140_s22  ;;  %s3146_s23 = scalar_lea.vmem (!%p3537_p4), [#allocation5], %s2048_s16 }
  0xfa   : > { %2744 = dma.done.wait (%p3077_p6), %s372_s15, 128  }
  0xfb   : > { %2746 = vsyncadd (%p3077_p6), %s372_s15, 4294967168  ;;  %p3538_p13 = scmp.ne.s32.totalorder %s3520_s12, 0 }
  0xfd   : > { %2748 = dma.done.wait (%p3538_p13), [#allocation9], 1088  }
  0xfe   : > { %2750 = vsyncadd (%p3538_p13), [#allocation9], 4294966208 }
  0xff   : > { %2752 = dma.done.wait (%p3538_p13), [#allocation12], 512  }
 0x100   : > { %2754 = vsyncadd (%p3538_p13), [#allocation12], 4294966784 }
 0x101   : > { %2756 = dma.done.wait (%p3538_p13), [#allocation15], 1056  }
 0x102   : > { %2758 = vsyncadd (%p3538_p13), [#allocation15], 4294966240 }
 0x103   : > { %2760 = dma.done.wait (%p3538_p13), [#allocation18], 128  }
 0x104   : > { %2762 = vsyncadd (%p3538_p13), [#allocation18], 4294967168  ;;  %vm441_vm0 = vcmask 253952   ;;  %v449_v0 = vlaneseq  ;;  %v2803_v1 = vmov 0.0   ;;  %vm2804_vm1 = vmmov 0   ;;  %v2443_v3 = vld [vmem:[#allocation10] sm:$0xff]  }
 0x105   : > { %2143 = vmatprep.subr.bf16.mxu0 %v2803_v1  ;;  %2151 = vmatprep.subr.bf16.mxu1 %v2803_v1  ;;  %442 = vst.msk [vmem:[#allocation2] sm:$0x1] %vm441_vm0, %v2803_v1  ;;  %vm461_vm2 = vcmask 261127   ;;  %v2444_v4 = vld [vmem:[#allocation10 + $0x10] sm:$0xff]   ;;  %v2445_v6 = vld [vmem:[#allocation10 + $0x8] sm:$0xff]   ;;  %v2446_v8 = vld [vmem:[#allocation10 + $0x18] sm:$0xff]  }
 0x106   : > { %2147 = vmatprep.mubr.msk.bf16.mxu0 %vm2804_vm1, %v2803_v1  ;;  %2155 = vmatprep.mubr.msk.bf16.mxu1 %vm2804_vm1, %v2803_v1  ;;  %v3176_v2 = vshrl.u32 %v449_v0, 7  ;;  %v448_v9 = vld [vmem:[%s3146_s23] sm:$0xff]  ;;  %v463_v11 = vld [vmem:[#allocation8] sm:$0xf]  ;;  %vm506_vm4 = vcmask 261120   ;;  %v2447_v24 = vld [vmem:[#allocation10 + $0x20] sm:$0xff]  }
 0x107   : > { %2144 = vmatpush3.bf16.msra.mxu0 %v2443_v3  ;;  %2152 = vmatpush3.bf16.msra.mxu1 %v2444_v4  ;;  %v453_v13 = vrot.slane %v448_v9, 7  ;;  %v2448_v28 = vld [vmem:[#allocation10 + $0x28] sm:$0xff]   ;;  %vm443_vm5 = vcmask 64512   ;;  %v2449_v30 = vld [vmem:[#allocation10 + $0x30] sm:$0xff]   ;;  %v2450_v32 = vld [vmem:[#allocation10 + $0x38] sm:$0xff]   ;;  %s2805_s12 = smov 120  }
 0x108   : > { %v3179_v5 = vsub.s32 0, %v3176_v2  ;;  %v3182_v7 = vsub.s32 1, %v3176_v2  ;;  %2145 = vmatprep.subr.bf16.mxu0 %v2803_v1  ;;  %vm451_vm3 = vcmp.eq.s32.totalorder %v3176_v2, 0  ;;  %2153 = vmatprep.subr.bf16.mxu1 %v2803_v1  ;;  %v3189_v12 = vsub.s32 2, %v3176_v2  ;;  %444 = vst.msk [vmem:[#allocation3] sm:$0xff] %vm443_vm5, %v2803_v1  ;;  %445 = vst.msk [vmem:[#allocation3 + $0x8] sm:$0xff] %vm443_vm5, %v2803_v1 }
 0x109   : > { %446 = vst.msk [vmem:[#allocation3 + $0x10] sm:$0xff] %vm443_vm5, %v2803_v1  ;;  %447 = vst.msk [vmem:[#allocation3 + $0x18] sm:$0xff] %vm443_vm5, %v2803_v1  ;;  %v3217_v31 = vsub.s32 3, %v3176_v2  ;;  %v740_v37 = vld [vmem:[#allocation13] sm:$0xff]  ;;  %v2072_v38 = vld [vmem:[#allocation14] ss:$0 sm:$0xff] }
 0x10a   : > { %v468_v14 = vrot.slane %v463_v11, %v3179_v5  ;;  %v474_v15 = vrot.slane %v463_v11, %v3182_v7  ;;  %v480_v18 = vrot.slane %v463_v11, %v3189_v12  ;;  %v742_v39 = vld [vmem:[#allocation13 + $0x8] sm:$0xff]  ;;  %v2071_v42 = vld [vmem:[#allocation14 + $0x1] ss:$0 sm:$0xff]  ;;  %vm835_vm6 = vcmask 1043456   ;;  %s2806_s13 = smov 112   ;;  %s2807_s21 = smov 104  }
 0x10b   : > { %2146 = vmatpush3.bf16.msra.mxu0 %v2445_v6  ;;  %2154 = vmatpush3.bf16.msra.mxu1 %v2446_v8  ;;  %v486_v33 = vrot.slane %v463_v11, %v3217_v31  ;;  %v2808_v8 = vmov 0   ;;  %s2809_s19 = smov 8   ;;  %s2810_s20 = smov 16   ;;  %vm1281_vm9 = vcmask 130112   ;;  %vm1544_vm10 = vcmask 195712  }
 0x10c   : > { %v2057_v10 = vld [vmem:[#allocation2] ss:$0 sm:$0xff]  ;;  %2159 = vmatprep.subr.bf16.mxu0 %v2803_v1  ;;  %2167 = vmatprep.subr.bf16.mxu1 %v2803_v1  ;;  %s2811_s24 = smov 24   ;;  %vm1807_vm11 = vcmask 261312   ;;  %s3539_s1 = sld [smem:[#allocation26_spill]] }
 0x10d   : > { %462 = vst.msk [vmem:[#allocation2 - $0x7] sm:$0x80] %vm461_vm2, %v448_v9  ;;  %v460_v16 = vsel %vm451_vm3, %v2057_v10, %v453_v13  ;;  %s435_s11 = scalar_lea.vmem [#allocation19], %s2048_s16  ;;  %s3540_s25 = sld [smem:[#allocation31_spill]] }
 0x10e   : > { %v464_v17 = vsub.f32 %v448_v9, %v460_v16  ;;  %v769_v9 = vld [vmem:[#allocation16] sm:$0xff]  ;;  %s1887_s8 = sshll.u32 %s435_s11, 4  ;;  %s1873_s15 = scalar_lea.sflag [#allocation7], %s3140_s22  ;;  %s3447_s8 = int_to_ptr.vmem [resolvable:$true] %s1887_s8 }
 0x10f   : > { %s2691_s23 = scalar_lea.vmem %s3447_s8, 128  ;;  %p3541_p2 = scmp.ne.s32.totalorder %s3534_s14, 0 }
 0x110   : > { %v469_v19 = vmul.f32 %v468_v14, %v464_v17  ;;  %v475_v20 = vmul.f32 %v474_v15, %v464_v17  ;;  %v481_v23 = vmul.f32 %v480_v18, %v464_v17  ;;  %v487_v34 = vmul.f32 %v486_v33, %v464_v17  ;;  %p2692_p6 = scmp.ne.s32.totalorder %s3447_s8, %s2691_s23  ;;  %s2812_s16 = smov [#allocation19]  }
 0x112   : > { %v470_v21 = vadd.f32 %v469_v19, %v460_v16  ;;  %v476_v22 = vadd.f32 %v475_v20, %v460_v16  ;;  %v482_v27 = vadd.f32 %v481_v23, %v460_v16  ;;  %v488_v35 = vadd.f32 %v487_v34, %v460_v16  ;;  %v1018_v19 = vld [vmem:[#allocation16 + $0x8] sm:$0xff]  ;;  %s2093_s18 = sshll.u32 %s3539_s1, 7  ;;  %p2693_p5 = pnand %p2692_p6, %p3541_p2 }
 0x113   : > { %s3445_s17 = scalar_lea.hbm %s3540_s25, %s2093_s18 }
 0x114   : > { %v489_v25 = vpack.c.bf16 %v470_v21, %v470_v21  ;;  %v550_v26 = vpack.c.bf16 %v476_v22, %v476_v22  ;;  %v611_v29 = vpack.c.bf16 %v482_v27, %v482_v27  ;;  %v672_v36 = vpack.c.bf16 %v488_v35, %v488_v35  ;;  %p2694_p7 = pneg %p2693_p5 }
 0x116   : > { %2148 = vmatmul.mubr.msk.bf16.vlgmr.msra.gmra.mrb[0].mxu0 %vm506_vm4, %v489_v25  ;;  %2156 = vmatmul.mubr.msk.bf16.vlgmr.msra.gmra.mrb[0].mxu1 %vm506_vm4, %v550_v26 }
 0x117   : > { %2160 = vmatpush3.bf16.msra.mxu0 %v2447_v24  ;;  %2163 = vmatprep.mubr.msk.bf16.mxu0 %vm2804_vm1, %v2803_v1 }
 0x118   : > { %2161 = vmatprep.subr.bf16.mxu0 %v2803_v1  ;;  %2171 = vmatprep.mubr.msk.bf16.mxu1 %vm2804_vm1, %v2803_v1 }
 0x119   : > { %2168 = vmatpush3.bf16.msra.mxu1 %v2449_v30 }
 0x11a   : > { %2169 = vmatprep.subr.bf16.mxu1 %v2803_v1 }
 0x11b   : > { %2162 = vmatpush3.bf16.msra.mxu0 %v2448_v28 }
 0x11c   : > { %2175 = vmatprep.subr.bf16.mxu0 %v2803_v1 }
 0x11d   : > { %2170 = vmatpush3.bf16.msra.mxu1 %v2450_v32 }
 0x11e   : > { %2164 = vmatmul.mubr.msk.bf16.vlgmr.msra.gmra.mrb[4].mxu0 %vm506_vm4, %v611_v29  ;;  %2181 = vmatprep.subr.bf16.mxu1 %v2803_v1 }
 0x11f   : > { %2177 = vmatprep.mubr.msk.bf16.mxu0 %vm2804_vm1, %v2803_v1 }
 0x120   : > { %2172 = vmatmul.mubr.msk.bf16.vlgmr.msra.gmra.mrb[4].mxu1 %vm506_vm4, %v672_v36 }
 0x121   : > { %2183 = vmatprep.mubr.msk.bf16.mxu1 %vm2804_vm1, %v2803_v1 }
 0x1e9   : > { %v544_v40 = vpop.f32.mrb[0].mxu0  ;;  %v605_v41 = vpop.f32.mrb[0].mxu1 }
 0x1ea   : > { %v745_v43 = vmul.f32 %v740_v37, %v544_v40  ;;  %v760_v44 = vmul.f32 %v2072_v38, %v544_v40  ;;  %v747_v45 = vmul.f32 %v742_v39, %v605_v41  ;;  %v2157_v46 = vpop.f32.mrb[1].mxu1  ;;  %v2149_v47 = vpop.f32.mrb[1].mxu0  ;;  %v1286_v39 = vld [vmem:[#allocation16 + $0x10] sm:$0xff]  ;;  %v1549_v40 = vld [vmem:[#allocation16 + $0x18] sm:$0xff] }
 0x1eb   : > { %v608_v48 = vpop.f32.mrb[2].mxu1  ;;  %v547_v49 = vpop.f32.mrb[2].mxu0 }
 0x1ec   : > { %v3225_v50 = vpack.c.bf16 %v745_v43, %v745_v43  ;;  %v752_v51 = vmul.f32 %v2071_v42, %v747_v45  ;;  %v754_v52 = vpack.c.bf16 %v747_v45, %v747_v45  ;;  %v761_v53 = vmul.f32 %v760_v44, %v605_v41  ;;  %v2158_v54 = vpop.f32.mrb[3].mxu1  ;;  %v2150_v55 = vpop.f32.mrb[3].mxu0  ;;  %v3311_v41 = vld [vmem:[#allocation3] sm:$0xff] }
 0x1ed   : > { %v3314_v43 = vand.u32 127, %v449_v0 }
 0x1ee   : > { %v3227_v56 = vpack.c.bf16 %v752_v51, %v752_v51  ;;  %1029 = vrot.lane.b32.xlu1 %v3225_v50, %s2805_s12  ;;  %v784_v57 = vsel %vm443_vm5, %v754_v52, 0  ;;  %v826_v18 = vsel %vm443_vm5, %v761_v53, 0.0 }
 0x1ef   : > { %2176 = vmatpush3.bf16.xpose.msra.mxu0 %v784_v57  ;;  %vm765_vm7 = vcmp.eq.s32.totalorder %v3176_v2, %v3314_v43  ;;  %vm764_vm8 = vcmp.gt.s32.totalorder %v3176_v2, %v3314_v43 }
 0x1f0   : > { %1189 = vrot.lane.b32.xlu0 %v3227_v56, %s2805_s12  ;;  %2193 = vmatprep.subr.bf16.mxu0 %v2803_v1 }
 0x1f1   : > { %v666_v58 = vpop.f32.mrb[4].mxu0 }
 0x1f2   : > { %1452 = vrot.lane.b32.xlu1 %v3227_v56, %s2806_s13  ;;  %v3237_v59 = vpack.c.bf16 %v666_v58, %v666_v58  ;;  %v2165_v60 = vpop.f32.mrb[5].mxu0 }
 0x1f3   : > { %v669_v61 = vpop.f32.mrb[6].mxu0  ;;  %v3338_v51 = vpop.f32.mrb[4].mxu1 }
 0x1f4   : > { %1032 = vrot.lane.b32.xlu0 %v754_v52, %s2805_s12  ;;  %v2166_v62 = vpop.f32.mrb[7].mxu0  ;;  %v837_v63 = vsel %vm835_vm6, %v3237_v59, 0 }
 0x1f5   : > { %2182 = vmatpush3.bf16.msra.mxu1 %v837_v63 }
 0x1f6   : > { %2178 = vmatmul.mubr.msk.bf16.vlgmr.msra.gmra.mrb[8].mxu0 %vm443_vm5, %v3225_v50  ;;  %2187 = vmatprep.subr.bf16.mxu1 %v2803_v1 }
 0x1f7   : > { %2194 = vmatpush3.bf16.msra.mxu0 %v837_v63  ;;  %2195 = vmatprep.mubr.msk.bf16.mxu0 %vm2804_vm1, %v2803_v1  ;;  %v3342_v63 = vld [vmem:[#allocation3 + $0x8] sm:$0xff] }
 0x1f8   : > { %1298 = vrot.lane.b32.xlu0 %v754_v52, %s2806_s13  ;;  %2199 = vmatprep.subr.bf16.mxu0 %v2803_v1 }
 0x1fc   : > { %1296 = vrot.lane.b32.xlu0 %v3225_v50, %s2806_s13 }
 0x200   : > { %1091 = vrot.lane.b32.xlu0 %v3237_v59, %s2805_s12 }
 0x204   : > { %1355 = vrot.lane.b32.xlu0 %v3237_v59, %s2806_s13 }
 0x215   : > { %928 = vxpose.xlu1.c.b16.start.end [1/1] (short) (narrow) %v3227_v56, 16 }
 0x219   : > { %1561 = vrot.lane.b32.xlu1 %v754_v52, %s2807_s21  ;;  %v2173_v52 = vpop.f32.mrb[5].mxu1 }
 0x21d   : > { %1559 = vrot.lane.b32.xlu1 %v3225_v50, %s2807_s21 }
 0x260   : > { %v3259_v3 = vpop.permute.xlu1 %1029 }
 0x262   : > { %v1190_v4 = vpop.permute.xlu0 %1189 }
 0x263   : > { %1192 = vxpose.xlu0.c.b16.start.end [1/1] (short) (narrow) %v1190_v4, 16 }
 0x264   : > { %v1453_v6 = vpop.permute.xlu1 %1452 }
 0x265   : > { %1455 = vxpose.xlu1.c.b16.start.end [1/1] (short) (narrow) %v1453_v6, 16 }
 0x266   : > { %v1033_v10 = vpop.permute.xlu0 %1032 }
 0x267   : > { %v1038_v14 = vsel %vm443_vm5, %v1033_v10, 0 }
 0x269   : > { %1609 = vrot.lane.b32.xlu1 %v761_v53, %s2807_s21 }
 0x26a   : > { %2441 = vset.pattern.permute.xlu1 %v2808_v8  ;;  %v1299_v11 = vpop.permute.xlu0 %1298 }
 0x26b   : > { %v1304_v23 = vsel %vm443_vm5, %v1299_v11, 0 }
 0x26c   : > { %1081 = vrot.lane.b32.xlu0 %v761_v53, %s2805_s12  ;;  %s2695_s12 = sshll.u32 %s2812_s16, 4  ;;  %s2696_s12 = int_to_ptr.vmem [resolvable:$false] %s2695_s12 }
 0x26d   : > { %774 = vperm.xlu1 %2441, %v769_v9   ;;  %2442 = vset.pattern.permute.xlu0 %v2808_v8  ;;  %p2698_p11 = scmp.lt.s32.totalorder %s3447_s8, %s2696_s12 }
 0x26e   : > { %v3266_v15 = vpop.permute.xlu0 %1296 }
 0x270   : > { %1346 = vrot.lane.b32.xlu0 %v761_v53, %s2806_s13  ;;  %v730_v53 = vpop.f32.mrb[6].mxu1  ;;  %s2697_s13 = scalar_lea.vmem %s2696_s12, 256 }
 0x271   : > { %v2174_v54 = vpop.f32.mrb[7].mxu1  ;;  %p2699_p12 = scmp.lt.s32.totalorder %s2697_s13, %s2691_s23 }
 0x272   : > { %v1092_v16 = vpop.permute.xlu0 %1091 }
 0x273   : > { %v3272_v17 = vsel %vm835_vm6, %v1092_v16, 0  ;;  %p2700_p0 = por %p2699_p12, %p2698_p11 }
 0x275   : > { %p2701_p8 = pnand %p2700_p0, %p2694_p7 }
 0x276   : > { %v1356_v20 = vpop.permute.xlu0 %1355 }
 0x277   : > { %v3289_v29 = vsel %vm835_vm6, %v1356_v20, 0 }
 0x27b   : > { %v936_v13 = vpop.trf.xlu1 }
 0x27c   : > { %2196 = vmatmul.mubr.msk.bf16.vlgmr.msra.gmra.mrb[12].mxu0 %vm443_vm5, %v936_v13 }
 0x27d   : > { %2200 = vmatpush3.bf16.xpose.msra.mxu0 %v1038_v14  ;;  %2201 = vmatprep.mubr.msk.bf16.mxu0 %vm2804_vm1, %v2803_v1 }
 0x27e   : > { %2217 = vmatprep.subr.bf16.mxu0 %v2803_v1 }
 0x284   : > { %2202 = vmatmul.mubr.msk.bf16.vlgmr.msra.gmra.mrb[16].mxu0 %vm443_vm5, %v3259_v3 }
 0x285   : > { %2218 = vmatpush3.bf16.msra.mxu0 %v3272_v17  ;;  %2219 = vmatprep.mubr.msk.bf16.mxu0 %vm2804_vm1, %v2803_v1 }
 0x286   : > { %2223 = vmatprep.subr.bf16.mxu0 %v2803_v1 }
 0x28b   : > { %v1562_v25 = vpop.permute.xlu1 %1561 }
 0x28c   : > { %v1567_v32 = vsel %vm443_vm5, %v1562_v25, 0 }
 0x28f   : > { %827 = vadd.xlane.f32.xlu0 %v826_v18  ;;  %v3286_v28 = vpop.permute.xlu1 %1559 }
 0x2a5   : > { %1023 = vperm.xlu0 %2442, %v1018_v19  }
 0x2c9   : > { %v1200_v21 = vpop.trf.xlu0  ;;  %v820_v22 = vpop.f32.mrb[8].mxu0 }
 0x2ca   : > { %2220 = vmatmul.mubr.msk.bf16.vlgmr.msra.gmra.mrb[20].mxu0 %vm443_vm5, %v1200_v21  ;;  %v2179_v24 = vpop.f32.mrb[9].mxu0  ;;  %v3366_v21 = vld [vmem:[#allocation3 + $0x10] sm:$0xff] }
 0x2cb   : > { %2224 = vmatpush3.bf16.xpose.msra.mxu0 %v1304_v23  ;;  %2225 = vmatprep.mubr.msk.bf16.mxu0 %vm2804_vm1, %v2803_v1  ;;  %v823_v26 = vpop.f32.mrb[10].mxu0  ;;  %v1463_v30 = vpop.trf.xlu1 }
 0x2cc   : > { %2241 = vmatprep.subr.bf16.mxu0 %v2803_v1  ;;  %v2180_v27 = vpop.f32.mrb[11].mxu0 }
 0x2d2   : > { %2226 = vmatmul.mubr.msk.bf16.vlgmr.msra.gmra.mrb[24].mxu0 %vm443_vm5, %v3266_v15 }
 0x2d3   : > { %2242 = vmatpush3.bf16.msra.mxu0 %v3289_v29  ;;  %2243 = vmatprep.mubr.msk.bf16.mxu0 %vm2804_vm1, %v2803_v1 }
 0x2d4   : > { %2247 = vmatprep.subr.bf16.mxu0 %v2803_v1 }
 0x2da   : > { %2244 = vmatmul.mubr.msk.bf16.vlgmr.msra.gmra.mrb[28].mxu0 %vm443_vm5, %v1463_v30 }
 0x2db   : > { %v1610_v33 = vpop.permute.xlu1 %1609  ;;  %2249 = vmatprep.mubr.msk.bf16.mxu0 %vm2804_vm1, %v2803_v1 }
 0x2dc   : > { %2248 = vmatpush3.bf16.xpose.msra.mxu0 %v1567_v32  ;;  %v1612_v34 = vsel %vm443_vm5, %v1610_v33, 0.0 }
 0x2dd   : > { %1613 = vadd.xlane.f32.xlu0 %v1612_v34  ;;  %2265 = vmatprep.subr.bf16.mxu0 %v2803_v1 }
 0x2de   : > { %v1082_v35 = vpop.permute.xlu0 %1081 }
 0x2df   : > { %v1084_v36 = vsel %vm443_vm5, %v1082_v35, 0.0 }
 0x2e0   : > { %1085 = vadd.xlane.f32.xlu1 %v1084_v36 }
 0x2e2   : > { %v1347_v37 = vpop.permute.xlu0 %1346 }
 0x2e3   : > { %2250 = vmatmul.mubr.msk.bf16.vlgmr.msra.gmra.mrb[32].mxu0 %vm443_vm5, %v3286_v28  ;;  %v1349_v38 = vsel %vm443_vm5, %v1347_v37, 0.0 }
 0x2e4   : > { %1350 = vadd.xlane.f32.xlu1 %v1349_v38  ;;  %2267 = vmatprep.mubr.msk.bf16.mxu0 %vm2804_vm1, %v2803_v1 }
 0x2ec   : > { %v775_v42 = vpop.permute.xlu1 %774 }
 0x2ed   : > { %v777_v44 = vmul.f32 %v775_v42, %v3311_v41 }
 0x2ef   : > { %v778_v45 = vpack.c.bf16 %v777_v44, %v777_v44 }
 0x2f1   : > { %v880_v49 = vsel %vm835_vm6, %v778_v45, 0 }
 0x2f5   : > { %1291 = vperm.xlu1 %2441, %v1286_v39  }
 0x2f9   : > { %1618 = vrot.lane.b32.xlu1 %v3237_v59, %s2807_s21 }
 0x2fd   : > { %1554 = vperm.xlu1 %2441, %v1549_v40   ;;  %v3382_v40 = vld [vmem:[#allocation3 + $0x18] sm:$0xff] }
 0x31c   : > { %v828_v46 = vpop.xlane.xlu0 %827 }
 0x31d   : > { %v829_v47 = vsel %vm765_vm7, %v828_v46, 0.0 }
 0x31e   : > { %v830_v48 = vsel %vm764_vm8, %v820_v22, %v829_v47 }
 0x31f   : > { %v831_v0 = vpack.c.bf16 %v830_v48, %v830_v48 }
 0x321   : > { %2184 = vmatmul.mubr.msk.bf16.vlgmr.msra.gmra.mrb[8].mxu1 %vm443_vm5, %v831_v0 }
 0x322   : > { %2188 = vmatpush3.bf16.msra.mxu1 %v880_v49  ;;  %2189 = vmatprep.mubr.msk.bf16.mxu1 %vm2804_vm1, %v2803_v1 }
 0x323   : > { %2205 = vmatprep.subr.bf16.mxu1 %v2803_v1 }
 0x324   : > { %v1024_v4 = vpop.permute.xlu0 %1023 }
 0x325   : > { %v1026_v6 = vmul.f32 %v1024_v4, %v3342_v63 }
 0x327   : > { %v1027_v8 = vpack.c.bf16 %v1026_v6, %v1026_v6 }
 0x329   : > { %v1140_v13 = vsel %vm835_vm6, %v1027_v8, 0 }
 0x32d   : > { %2190 = vmatmul.mubr.msk.bf16.vlgmr.msra.gmra.mrb[8].mxu1 %vm443_vm5, %v3225_v50 }
 0x32e   : > { %2206 = vmatpush3.bf16.msra.mxu1 %v3272_v17  ;;  %2207 = vmatprep.mubr.msk.bf16.mxu1 %vm2804_vm1, %v2803_v1 }
 0x32f   : > { %2211 = vmatprep.subr.bf16.mxu1 %v2803_v1 }
 0x34f   : > { %v3340_v55 = vpop.f32.mrb[12].mxu0 }
 0x350   : > { %v2197_v57 = vpop.f32.mrb[13].mxu0 }
 0x351   : > { %v984_v58 = vpop.f32.mrb[14].mxu0 }
 0x352   : > { %v2198_v59 = vpop.f32.mrb[15].mxu0 }
 0x357   : > { %v1074_v60 = vpop.f32.mrb[16].mxu0 }
 0x358   : > { %v2203_v61 = vpop.f32.mrb[17].mxu0 }
 0x359   : > { %v1077_v50 = vpop.f32.mrb[18].mxu0 }
 0x35a   : > { %v2204_v62 = vpop.f32.mrb[19].mxu0 }
 0x36a   : > { %v1614_v44 = vpop.xlane.xlu0 %1613 }
 0x36b   : > { %v1615_v47 = vsel %vm765_vm7, %v1614_v44, 0.0 }
 0x36d   : > { %v1086_v9 = vpop.xlane.xlu1 %1085 }
 0x36e   : > { %v1087_v10 = vsel %vm765_vm7, %v1086_v9, 0.0 }
 0x36f   : > { %v1088_v11 = vsel %vm764_vm8, %v1074_v60, %v1087_v10 }
 0x370   : > { %v1089_v14 = vpack.c.bf16 %v1088_v11, %v1088_v11 }
 0x371   : > { %v1351_v16 = vpop.xlane.xlu1 %1350 }
 0x372   : > { %2208 = vmatmul.mubr.msk.bf16.vlgmr.msra.gmra.mrb[12].mxu1 %vm443_vm5, %v1089_v14 }
 0x373   : > { %2212 = vmatpush3.bf16.msra.mxu1 %v1140_v13  ;;  %2213 = vmatprep.mubr.msk.bf16.mxu1 %vm2804_vm1, %v2803_v1 }
 0x374   : > { %2229 = vmatprep.subr.bf16.mxu1 %v2803_v1 }
 0x375   : > { %v1292_v17 = vpop.permute.xlu1 %1291 }
 0x376   : > { %v1294_v25 = vmul.f32 %v1292_v17, %v3366_v21 }
 0x378   : > { %v1295_v26 = vpack.c.bf16 %v1294_v25, %v1294_v25 }
 0x379   : > { %v1619_v18 = vpop.permute.xlu1 %1618 }
 0x37a   : > { %v1624_v19 = vsel %vm835_vm6, %v1619_v18, 0  ;;  %v1404_v35 = vsel %vm835_vm6, %v1295_v26, 0 }
 0x37b   : > { %2266 = vmatpush3.bf16.msra.mxu0 %v1624_v19 }
 0x37c   : > { %2271 = vmatprep.subr.bf16.mxu0 %v2803_v1 }
 0x37d   : > { %v1555_v42 = vpop.permute.xlu1 %1554 }
 0x37e   : > { %2214 = vmatmul.mubr.msk.bf16.vlgmr.msra.gmra.mrb[12].mxu1 %vm443_vm5, %v3259_v3  ;;  %v1352_v3 = vsel %vm765_vm7, %v1351_v16, 0.0  ;;  %v1557_v45 = vmul.f32 %v1555_v42, %v3382_v40 }
 0x37f   : > { %2230 = vmatpush3.bf16.msra.mxu1 %v3289_v29  ;;  %2231 = vmatprep.mubr.msk.bf16.mxu1 %vm2804_vm1, %v2803_v1 }
 0x380   : > { %2235 = vmatprep.subr.bf16.mxu1 %v2803_v1  ;;  %v1558_v52 = vpack.c.bf16 %v1557_v45, %v1557_v45 }
 0x382   : > { %v1667_v54 = vsel %vm835_vm6, %v1558_v52, 0 }
 0x39d   : > { %v3364_v20 = vpop.f32.mrb[20].mxu0 }
 0x39e   : > { %v2221_v22 = vpop.f32.mrb[21].mxu0 }
 0x39f   : > { %v1248_v23 = vpop.f32.mrb[22].mxu0 }
 0x3a0   : > { %v2222_v24 = vpop.f32.mrb[23].mxu0 }
 0x3a5   : > { %v1340_v27 = vpop.f32.mrb[24].mxu0 }
 0x3a6   : > { %v1353_v29 = vsel %vm764_vm8, %v1340_v27, %v1352_v3  ;;  %v2227_v30 = vpop.f32.mrb[25].mxu0 }
 0x3a7   : > { %v1354_v32 = vpack.c.bf16 %v1353_v29, %v1353_v29  ;;  %v1343_v33 = vpop.f32.mrb[26].mxu0 }
 0x3a8   : > { %v2228_v34 = vpop.f32.mrb[27].mxu0 }
 0x3a9   : > { %2232 = vmatmul.mubr.msk.bf16.vlgmr.msra.gmra.mrb[16].mxu1 %vm443_vm5, %v1354_v32 }
 0x3aa   : > { %2236 = vmatpush3.bf16.msra.mxu1 %v1404_v35  ;;  %2237 = vmatprep.mubr.msk.bf16.mxu1 %vm2804_vm1, %v2803_v1 }
 0x3ab   : > { %2253 = vmatprep.subr.bf16.mxu1 %v2803_v1 }
 0x3ad   : > { %v3380_v36 = vpop.f32.mrb[28].mxu0 }
 0x3ae   : > { %v2245_v37 = vpop.f32.mrb[29].mxu0 }
 0x3af   : > { %v1511_v38 = vpop.f32.mrb[30].mxu0 }
 0x3b0   : > { %v2246_v39 = vpop.f32.mrb[31].mxu0 }
 0x3b5   : > { %2238 = vmatmul.mubr.msk.bf16.vlgmr.msra.gmra.mrb[16].mxu1 %vm443_vm5, %v3266_v15 }
 0x3b6   : > { %v1603_v46 = vpop.f32.mrb[32].mxu0  ;;  %2254 = vmatpush3.bf16.msra.mxu1 %v1624_v19  ;;  %2255 = vmatprep.mubr.msk.bf16.mxu1 %vm2804_vm1, %v2803_v1 }
 0x3b7   : > { %v2251_v48 = vpop.f32.mrb[33].mxu0  ;;  %2259 = vmatprep.subr.bf16.mxu1 %v2803_v1  ;;  %v1616_v0 = vsel %vm764_vm8, %v1603_v46, %v1615_v47 }
 0x3b8   : > { %v1606_v49 = vpop.f32.mrb[34].mxu0  ;;  %v1617_v15 = vpack.c.bf16 %v1616_v0, %v1616_v0 }
 0x3b9   : > { %v2252_v53 = vpop.f32.mrb[35].mxu0 }
 0x3ba   : > { %v766_v53 = vld [vmem:[#allocation17] sm:$0xf] }
 0x3bd   : > { %2256 = vmatmul.mubr.msk.bf16.vlgmr.msra.gmra.mrb[20].mxu1 %vm443_vm5, %v1617_v15  ;;  %v767_v15 = vld [vmem:[#allocation17 + $0x4] sm:$0xf] }
 0x3be   : > { %2260 = vmatpush3.bf16.msra.mxu1 %v1667_v54  ;;  %2261 = vmatprep.mubr.msk.bf16.mxu1 %vm2804_vm1, %v2803_v1  ;;  %v1270_v54 = vrot.slane %v766_v53, %v3182_v7 }
 0x3c9   : > { %2262 = vmatmul.mubr.msk.bf16.vlgmr.msra.gmra.mrb[20].mxu1 %vm443_vm5, %v3286_v28 }
 0x400   : > { %v916_v57 = vpop.f32.mrb[8].mxu1 }
 0x401   : > { %v2191_v58 = vpop.f32.mrb[9].mxu1  ;;  %v989_v18 = vmul.f32 0.125, %v916_v57 }
 0x402   : > { %v919_v59 = vpop.f32.mrb[10].mxu1 }
 0x403   : > { %v2192_v2 = vpop.f32.mrb[11].mxu1  ;;  %v990_v23 = vsel %vm443_vm5, %v989_v18, 0.0  ;;  %v1275_v59 = vrot.slane %v767_v15, %v3182_v7 }
 0x451   : > { %v1176_v43 = vpop.f32.mrb[12].mxu1 }
 0x452   : > { %v1253_v60 = vmul.f32 0.125, %v1176_v43  ;;  %v2215_v61 = vpop.f32.mrb[13].mxu1 }
 0x453   : > { %v1179_v50 = vpop.f32.mrb[14].mxu1 }
 0x454   : > { %v2216_v62 = vpop.f32.mrb[15].mxu1  ;;  %v1254_v4 = vsel %vm443_vm5, %v1253_v60, 0.0 }
 0x455   : > { %1255 = vadd.xlane.f32.xlu1 %v1254_v4 }
 0x488   : > { %v1440_v6 = vpop.f32.mrb[16].mxu1 }
 0x489   : > { %v1516_v8 = vmul.f32 0.125, %v1440_v6  ;;  %v2239_v9 = vpop.f32.mrb[17].mxu1  ;;  %v1538_v6 = vrot.slane %v767_v15, %v3189_v12 }
 0x48a   : > { %v1443_v10 = vpop.f32.mrb[18].mxu1 }
 0x48b   : > { %v2240_v11 = vpop.f32.mrb[19].mxu1  ;;  %v1517_v13 = vsel %vm443_vm5, %v1516_v8, 0.0 }
 0x48c   : > { %1518 = vadd.xlane.f32.xlu0 %v1517_v13 }
 0x49c   : > { %v1703_v28 = vpop.f32.mrb[20].mxu1 }
 0x49d   : > { %v1779_v14 = vmul.f32 0.125, %v1703_v28  ;;  %v2263_v16 = vpop.f32.mrb[21].mxu1 }
 0x49e   : > { %v1706_v17 = vpop.f32.mrb[22].mxu1  ;;  %v1796_v16 = vrot.slane %v766_v53, %v3217_v31 }
 0x49f   : > { %v2264_v19 = vpop.f32.mrb[23].mxu1  ;;  %v1780_v22 = vsel %vm443_vm5, %v1779_v14, 0.0 }
 0x4a0   : > { %1781 = vadd.xlane.f32.xlu0 %v1780_v22  ;;  %v1801_v19 = vrot.slane %v767_v15, %v3217_v31  ;;  %v1551_v31 = vld [vmem:[#allocation16 + $0x38] sm:$0xff] }
 0x4a4   : > { %991 = vadd.xlane.f32.xlu0 %v990_v23 }
 0x4e2   : > { %v1256_v24 = vpop.xlane.xlu1 %1255 }
 0x4e3   : > { %v1257_v25 = vmul.f32 0.125, %v1256_v24 }
 0x4e5   : > { %v1258_v3 = vsub.f32 %v1253_v60, %v1257_v25 }
 0x4e7   : > { %v1259_v26 = vmul.f32 %v1258_v3, %v1258_v3 }
 0x4e9   : > { %v1260_v27 = vsel %vm443_vm5, %v1259_v26, 0.0 }
 0x4ea   : > { %1261 = vadd.xlane.f32.xlu0 %v1260_v27  ;;  %v771_v27 = vld [vmem:[#allocation16 + $0x20] sm:$0xff] }
 0x519   : > { %v1519_v29 = vpop.xlane.xlu0 %1518 }
 0x51a   : > { %v1520_v30 = vmul.f32 0.125, %v1519_v29 }
 0x51c   : > { %v1521_v32 = vsub.f32 %v1516_v8, %v1520_v30  ;;  %v1020_v30 = vld [vmem:[#allocation16 + $0x28] sm:$0xff] }
 0x51e   : > { %v1522_v33 = vmul.f32 %v1521_v32, %v1521_v32 }
 0x520   : > { %v1523_v34 = vsel %vm443_vm5, %v1522_v33, 0.0 }
 0x521   : > { %1524 = vadd.xlane.f32.xlu0 %v1523_v34 }
 0x52d   : > { %v1782_v35 = vpop.xlane.xlu0 %1781 }
 0x52e   : > { %v1783_v37 = vmul.f32 0.125, %v1782_v35 }
 0x530   : > { %v1784_v38 = vsub.f32 %v1779_v14, %v1783_v37 }
 0x531   : > { %v992_v39 = vpop.xlane.xlu0 %991 }
 0x532   : > { %v994_v42 = vmul.f32 0.125, %v992_v39  ;;  %v1785_v44 = vmul.f32 %v1784_v38, %v1784_v38 }
 0x534   : > { %v995_v45 = vsub.f32 %v989_v18, %v994_v42  ;;  %v1786_v46 = vsel %vm443_vm5, %v1785_v44, 0.0  ;;  %v2451_v42 = vld [vmem:[#allocation11] sm:$0xff]  }
 0x535   : > { %1787 = vadd.xlane.f32.xlu0 %v1786_v46  ;;  %v2452_v46 = vld [vmem:[#allocation11 + $0x8] sm:$0xff]  }
 0x536   : > { %v996_v47 = vmul.f32 %v995_v45, %v995_v45 }
 0x538   : > { %v997_v48 = vsel %vm443_vm5, %v996_v47, 0.0 }
 0x539   : > { %998 = vadd.xlane.f32.xlu1 %v997_v48 }
 0x54b   : > { %1715 = vrot.lane.b32.xlu0 %v3227_v56, %s2807_s21  ;;  %v1533_v56 = vrot.slane %v766_v53, %v3189_v12  ;;  %v1007_v12 = vrot.slane %v766_v53, %v3179_v5 }
 0x577   : > { %v1262_v0 = vpop.xlane.xlu0 %1261 }
 0x578   : > { %v1263_v49 = vmul.f32 0.125, %v1262_v0 }
 0x57a   : > { %v1264_v52 = vadd.f32 1e-05, %v1263_v49 }
 0x57c   : > { %2453 = vrsqrt.f32 %v1264_v52 }
 0x586   : > { %v2454_v57 = vpop.eup %2453 }
 0x587   : > { %v1266_v58 = vmul.f32 %v2454_v57, %v1258_v3  ;;  %v1012_v3 = vrot.slane %v767_v15, %v3179_v5  ;;  %v2070_v5 = vmul.f32 -1.442695, %v3338_v51 }
 0x589   : > { %v1271_v2 = vmul.f32 %v1270_v54, %v1266_v58 }
 0x58b   : > { %v1276_v43 = vadd.f32 %v1275_v59, %v1271_v2 }
 0x58d   : > { %1278 = vrot.lane.b32.xlu1 %v1276_v43, %s2809_s19 }
 0x5ae   : > { %v1525_v60 = vpop.xlane.xlu0 %1524 }
 0x5af   : > { %v1526_v61 = vmul.f32 0.125, %v1525_v60 }
 0x5b1   : > { %v1527_v50 = vadd.f32 1e-05, %v1526_v61 }
 0x5b3   : > { %2455 = vrsqrt.f32 %v1527_v50 }
 0x5bd   : > { %v2456_v62 = vpop.eup %2455 }
 0x5be   : > { %v1529_v4 = vmul.f32 %v2456_v62, %v1521_v32  ;;  %v1288_v32 = vld [vmem:[#allocation16 + $0x30] sm:$0xff] }
 0x5c0   : > { %v1534_v8 = vmul.f32 %v1533_v56, %v1529_v4 }
 0x5c2   : > { %v1788_v9 = vpop.xlane.xlu0 %1787  ;;  %v1539_v10 = vadd.f32 %v1538_v6, %v1534_v8 }
 0x5c3   : > { %v1789_v11 = vmul.f32 0.125, %v1788_v9 }
 0x5c4   : > { %1541 = vrot.lane.b32.xlu1 %v1539_v10, %s2810_s20 }
 0x5c5   : > { %v1790_v7 = vadd.f32 1e-05, %v1789_v11 }
 0x5c6   : > { %v999_v13 = vpop.xlane.xlu1 %998  ;;  %v1716_v33 = vpop.permute.xlu0 %1715 }
 0x5c7   : > { %2457 = vrsqrt.f32 %v1790_v7  ;;  %v1000_v28 = vmul.f32 0.125, %v999_v13 }
 0x5c9   : > { %v1001_v14 = vadd.f32 1e-05, %v1000_v28 }
 0x5cb   : > { %2459 = vrsqrt.f32 %v1001_v14 }
 0x5cc   : > { %2461 = vpow2.f32 %v2070_v5 }
 0x5d1   : > { %v2458_v17 = vpop.eup %2457 }
 0x5d2   : > { %v1792_v18 = vmul.f32 %v2458_v17, %v1784_v38 }
 0x5d4   : > { %v1797_v22 = vmul.f32 %v1796_v16, %v1792_v18 }
 0x5d5   : > { %v2460_v23 = vpop.eup %2459 }
 0x5d6   : > { %v1003_v24 = vmul.f32 %v2460_v23, %v995_v45  ;;  %v1802_v25 = vadd.f32 %v1801_v19, %v1797_v22  ;;  %v2462_v37 = vpop.eup %2461 }
 0x5d7   : > { %v736_v38 = vadd.f32 1.0, %v2462_v37 }
 0x5d8   : > { %1804 = vrot.lane.b32.xlu0 %v1802_v25, %s2811_s24  ;;  %v1008_v26 = vmul.f32 %v1007_v12, %v1003_v24 }
 0x5d9   : > { %2463 = vrcp.f32 %v736_v38 }
 0x5da   : > { %v1013_v29 = vadd.f32 %v1012_v3, %v1008_v26 }
 0x5dc   : > { %924 = vperm.xlu0 %2442, %v771_v27   ;;  %1014 = vst.msk [vmem:[#allocation4] sm:$0xff] %vm443_vm5, %v1013_v29 }
 0x5e0   : > { %1184 = vperm.xlu0 %2442, %v1020_v30  }
 0x5e3   : > { %v2464_v45 = vpop.eup %2463 }
 0x5e4   : > { %1448 = vperm.xlu0 %2442, %v1288_v32   ;;  %v739_v47 = vmul.f32 %v2464_v45, %v3338_v51 }
 0x5e7   : > { %1718 = vxpose.xlu1.c.b16.start.end [1/1] (short) (narrow) %v1716_v33, 16 }
 0x5e8   : > { %1711 = vperm.xlu0 %2442, %v1551_v31  }
 0x5ff   : > { %v1279_v34 = vpop.permute.xlu1 %1278 }
 0x600   : > { %1282 = vst.msk [vmem:[#allocation4] sm:$0xff] %vm1281_vm9, %v1279_v34 }
 0x636   : > { %v1542_v35 = vpop.permute.xlu1 %1541 }
 0x637   : > { %1545 = vst.msk [vmem:[#allocation4] sm:$0xff] %vm1544_vm10, %v1542_v35 }
 0x64a   : > { %v1805_v39 = vpop.permute.xlu0 %1804 }
 0x64b   : > { %1808 = vst.msk [vmem:[#allocation4] sm:$0xff] %vm1807_vm11, %v1805_v39 }
 0x64d   : > { %v1726_v44 = vpop.trf.xlu1 }
 0x64e   : > { %2268 = vmatmul.mubr.msk.bf16.vlgmr.msra.gmra.mrb[36].mxu0 %vm443_vm5, %v1726_v44 }
 0x64f   : > { %2272 = vmatpush3.bf16.msra.mxu0 %v2451_v42  ;;  %2275 = vmatprep.mubr.msk.bf16.mxu0 %vm2804_vm1, %v2803_v1 }
 0x650   : > { %2273 = vmatprep.subr.bf16.mxu0 %v2803_v1 }
 0x652   : > { %v1809_v48 = vld [vmem:[#allocation4] sm:$0xff] }
 0x653   : > { %2274 = vmatpush3.bf16.msra.mxu0 %v2452_v46  ;;  %v1810_v0 = vmul.f32 %v1809_v48, %v739_v47 }
 0x655   : > { %v1811_v49 = vpack.c.bf16 %v1810_v0, %v1810_v0 }
 0x657   : > { %2276 = vmatmul.mubr.msk.bf16.vlgmr.msra.gmra.mrb[40].mxu0 %vm506_vm4, %v1811_v49 }
 0x65b   : > { %v925_v52 = vpop.permute.xlu0 %924 }
 0x65c   : > { %v927_v53 = vmul.f32 %v925_v52, %v3311_v41 }
 0x65e   : > { %v987_v15 = vadd.f32 %v3340_v55, %v927_v53 }
 0x65f   : > { %v1185_v54 = vpop.permute.xlu0 %1184 }
 0x660   : > { %988 = vst.msk [vmem:[#allocation3] sm:$0xff] %vm443_vm5, %v987_v15  ;;  %v1187_v57 = vmul.f32 %v1185_v54, %v3342_v63 }
 0x662   : > { %v1251_v1 = vadd.f32 %v3364_v20, %v1187_v57 }
 0x663   : > { %v1449_v51 = vpop.permute.xlu0 %1448 }
 0x664   : > { %1252 = vst.msk [vmem:[#allocation3 + $0x8] sm:$0xff] %vm443_vm5, %v1251_v1  ;;  %v1451_v58 = vmul.f32 %v1449_v51, %v3366_v21 }
 0x666   : > { %v1514_v59 = vadd.f32 %v3380_v36, %v1451_v58 }
 0x667   : > { %v1712_v41 = vpop.permute.xlu0 %1711 }
 0x668   : > { %1515 = vst.msk [vmem:[#allocation3 + $0x10] sm:$0xff] %vm443_vm5, %v1514_v59  ;;  %v1714_v55 = vmul.f32 %v1712_v41, %v3382_v40 }
 0x721   : > { %v1771_v2 = vpop.f32.mrb[36].mxu0 }
 0x722   : > { %v1777_v43 = vadd.f32 %v1771_v2, %v1714_v55  ;;  %v2269_v60 = vpop.f32.mrb[37].mxu0 }
 0x723   : > { %v1774_v63 = vpop.f32.mrb[38].mxu0 }
 0x724   : > { %1778 = vst.msk [vmem:[#allocation3 + $0x18] sm:$0xff] %vm443_vm5, %v1777_v43  ;;  %v2270_v20 = vpop.f32.mrb[39].mxu0 }
 0x72a   : > { %v1865_v21 = vpop.f32.mrb[40].mxu0 }
 0x72b   : > { %1871 = vst.msk [vmem:[%s435_s11] sm:$0xff] %vm506_vm4, %v1865_v21  ;;  %v2277_v36 = vpop.f32.mrb[41].mxu0 }
 0x72c   : > { %v1868_v40 = vpop.f32.mrb[42].mxu0 }
 0x72d   : > { %2704 = shalt.err (!%p2701_p8)
}
 0x72e   : > { %s2705_s22 = scalar_lea.hbm %s3445_s17, 128  ;;  %s2709_s20 = scalar_lea.hbm %s3540_s25, 256 }
 0x72f   : > { %p2706_p9 = scmp.ne.s32.totalorder %s3445_s17, %s2705_s22  ;;  %p2710_p10 = scmp.lt.u32.totalorder %s3445_s17, %s3540_s25 }
 0x730   : > { %p2711_p4 = scmp.lt.u32.totalorder %s2709_s20, %s2705_s22  ;;  %p2713_p6 = scmp.lt.u32.totalorder %s2705_s22, %s3445_s17 }
 0x731   : > { %p2707_p1 = pnand %p2706_p9, %p3541_p2 }
 0x732   : > { %p2712_p13 = por %p2711_p4, %p2710_p10 }
 0x733   : > { %p2708_p3 = pneg %p2707_p1 }
 0x734   : > { %p2714_p5 = por %p2713_p6, %p2712_p13 }
 0x736   : > { %p2715_p7 = pnand %p2714_p5, %p2708_p3 }
 0x738   : > { %2718 = shalt.err (!%p2715_p7)
}
 0x739   : > { %2325 = dma.vmem_to_hbm [thread:$0]  (%p3541_p2), %s3447_s8, 128, %s3445_s17, %s1873_s15   ;;  %v2278_v61 = vpop.f32.mrb[43].mxu0 }
 0x73a PF: > { %s1899_s18 = sand.u32 1, %s2769_s27   ;;  %p3542_p11 = scmp.ne.s32.totalorder %s3535_s3, 0 }
 0x73b   : > { %p3543_p12 = scmp.ge.s32.totalorder %s2789_s10, 2  ;;  %s1900_s11 = scalar_lea.sflag [#allocation7], %s1899_s18 }
 0x73d   : > { %p2354_p0 = pnand %p3543_p12, %p3542_p11 }
 0x73f   : > { %2764 = dma.done.wait (!%p2354_p0), %s1900_s11, 128  }
 0x740   : > { %2766 = vsyncadd (!%p2354_p0), %s1900_s11, 4294967168  ;;  %s28_s10 = sadd.s32 1, %s2789_s10   ;;  %s3544_s27 = smov %s2773_s28 }
 0x741   : > { %p25_p8 = scmp.ge.s32.totalorder %s28_s10, 4   ;;  %s3545_s28 = smov %s2777_s29 }
 0x742   : > { %s3546_s29 = smov %s3091_s2  ;;  %s3547_s30 = smov %s2785_s9 }
 0x743   : > { %s3548_s9 = smov %s3550_s26  ;;  %27 = sbr.rel (!%p25_p8) target bundleno = 16 (0x10), region = 143 }
 0x74a   :  { %1905 = vsyncpa [#allocation6], 1 }
 0x74b   :  { %1907 = vsyncpa [#allocation6 + $0x1], 1 }
 0x74c   :  { %1908 = vsyncpa [#allocation9], 1 }
 0x74d   :  { %1909 = vsyncpa [#allocation12], 1 }
 0x74e   :  { %1910 = vsyncpa [#allocation15], 1 }
 0x74f   :  { %1911 = vsyncpa [#allocation18], 1 }
 0x750   :  { %1912 = vsyncpa [#allocation7], 1 }
 0x751   :  { %1914 = vsyncpa [#allocation7 + $0x1], 1 }

</bundles_post_ra>
